<compile_context>
chip_gen: v5e
topology: v5e:2x2
jax: 0.10.0
libtpu: 0.0.40
codegen_flags: <defaults>
</compile_context>

<pallas_src>
import math
import functools

import jax
import jax.numpy as jnp
from jax.experimental import pallas as pl
from jax.experimental.pallas import tpu as pltpu  # noqa: F401  (TPU backend assumed)

CFG = dict(
    vocab=100, type_vocab=2, max_pos=32,
    hidden=128, heads=4, intermediate=512, layers=2,
    num_labels=6, ln_eps=1e-12,
)

_LABEL_PAD = 128  # classifier output padded to a full 128-lane vector (lane-dense store)


# ---------------------------------------------------------------------------
# In-kernel helpers
# ---------------------------------------------------------------------------

def _bf16_dot(a, w):
    """MXU matmul: bf16 inputs, f32 accumulation."""
    return jnp.dot(a.astype(jnp.bfloat16), w.astype(jnp.bfloat16),
                   preferred_element_type=jnp.float32)


def _layernorm(z, g, b, eps):
    mu = jnp.mean(z, axis=-1, keepdims=True)
    var = jnp.mean(jnp.square(z - mu), axis=-1, keepdims=True)
    return (z - mu) * jax.lax.rsqrt(var + eps) * g + b


def _gelu_erf(y):
    return 0.5 * y * (1.0 + jax.lax.erf(y * (1.0 / math.sqrt(2.0))))


# ---------------------------------------------------------------------------
# Pallas kernels (each is a single VMEM-resident block, no grid)
# ---------------------------------------------------------------------------

def _emb_ln_kernel(x_ref, y_ref, g_ref, b_ref, o_ref, *, eps):
    """Embeddings: residual add + LayerNorm over the hidden axis."""
    o_ref[...] = _layernorm(x_ref[...] + y_ref[...], g_ref[...], b_ref[...], eps)


def _attn_block_kernel(x_ref, wqkv_ref, bqkv_ref, wo_ref, bo_ref, g_ref, b_ref,
                       mask_ref, o_ref, *, B, S, heads, D, eps):
    """Fused: QKV projection -> all-heads attention -> output proj -> add + LN."""
    H = heads * D
    x = x_ref[...]                                            # (M, H) f32
    qkv = _bf16_dot(x, wqkv_ref[...]) + bqkv_ref[...]         # (M, 3H) f32
    mask = mask_ref[...]                                      # (B, 1, S) additive
    scale = 1.0 / math.sqrt(D)

    ctx_heads = []
    for h in range(heads):                                    # static unrolled loop
        q = qkv[:, h * D:(h + 1) * D].reshape(B, S, D)
        k = qkv[:, H + h * D:H + (h + 1) * D].reshape(B, S, D)
        v = qkv[:, 2 * H + h * D:2 * H + (h + 1) * D].reshape(B, S, D)
        s = jnp.einsum('bqd,bkd->bqk',
                       q.astype(jnp.bfloat16), k.astype(jnp.bfloat16),
                       preferred_element_type=jnp.float32) * scale     # (B, S, S)
        s = s + mask                                          # broadcast over query axis
        s = s - jnp.max(s, axis=-1, keepdims=True)
        p = jnp.exp(s)
        p = p / jnp.sum(p, axis=-1, keepdims=True)
        ch = jnp.einsum('bqk,bkd->bqd',
                        p.astype(jnp.bfloat16), v.astype(jnp.bfloat16),
                        preferred_element_type=jnp.float32)            # (B, S, D)
        ctx_heads.append(ch.reshape(B * S, D))
    ctx = jnp.concatenate(ctx_heads, axis=-1)                 # (M, H)

    attn_out = _bf16_dot(ctx, wo_ref[...]) + bo_ref[...]
    o_ref[...] = _layernorm(x + attn_out, g_ref[...], b_ref[...], eps)


def _ffn_block_kernel(x_ref, w1_ref, b1_ref, w2_ref, b2_ref, g_ref, b_ref, o_ref, *, eps):
    """Fused: FFN1 -> GELU -> FFN2 -> add + LN."""
    x = x_ref[...]
    h = _gelu_erf(_bf16_dot(x, w1_ref[...]) + b1_ref[...])
    ff = _bf16_dot(h, w2_ref[...]) + b2_ref[...]
    o_ref[...] = _layernorm(x + ff, g_ref[...], b_ref[...], eps)


def _head_kernel(cls_ref, wp_ref, bp_ref, wc_ref, bc_ref, o_ref):
    """Fused: tanh pooler on [CLS] + classifier (lane-padded output)."""
    pooled = jnp.tanh(_bf16_dot(cls_ref[...], wp_ref[...]) + bp_ref[...])
    # Dropout(p=0.2) is identity at inference (eval-mode semantics).
    o_ref[...] = _bf16_dot(pooled, wc_ref[...]) + bc_ref[...]


# ---------------------------------------------------------------------------
# Wrappers
# ---------------------------------------------------------------------------

def embed_layernorm(x, y, gamma, beta, eps):
    H = x.shape[-1]
    return pl.pallas_call(
        functools.partial(_emb_ln_kernel, eps=eps),
        out_shape=jax.ShapeDtypeStruct(x.shape, jnp.float32),
    )(x, y, gamma.reshape(1, H), beta.reshape(1, H))


def attention_block(x, lyr, add_mask, B, S, heads, D, eps):
    H = heads * D
    kern = functools.partial(_attn_block_kernel, B=B, S=S, heads=heads, D=D, eps=eps)
    return pl.pallas_call(
        kern,
        out_shape=jax.ShapeDtypeStruct(x.shape, jnp.float32),
    )(x, lyr["wqkv"], lyr["bqkv"].reshape(1, 3 * H),
      lyr["wo"], lyr["bo"].reshape(1, H),
      lyr["ln1_g"].reshape(1, H), lyr["ln1_b"].reshape(1, H),
      add_mask)


def ffn_block(x, lyr, eps):
    H = x.shape[-1]
    I = lyr["w1"].shape[1]
    return pl.pallas_call(
        functools.partial(_ffn_block_kernel, eps=eps),
        out_shape=jax.ShapeDtypeStruct(x.shape, jnp.float32),
    )(x, lyr["w1"], lyr["b1"].reshape(1, I),
      lyr["w2"], lyr["b2"].reshape(1, H),
      lyr["ln2_g"].reshape(1, H), lyr["ln2_b"].reshape(1, H))


def head_block(cls, pool_w, pool_b, fc_w_pad, fc_b_pad):
    B, H = cls.shape
    Np = fc_w_pad.shape[1]
    return pl.pallas_call(
        _head_kernel,
        out_shape=jax.ShapeDtypeStruct((B, Np), jnp.float32),
    )(cls, pool_w, pool_b.reshape(1, H), fc_w_pad, fc_b_pad.reshape(1, Np))


# ---------------------------------------------------------------------------
# Parameters (deterministic synthetic init) and forward pass
# ---------------------------------------------------------------------------

def init_params(key, cfg):
    H, I, L = cfg["hidden"], cfg["intermediate"], cfg["layers"]
    NL = cfg["num_labels"]

    def nrm(k, shape):
        return jax.random.normal(k, shape, jnp.float32) * 0.02

    keys = iter(jax.random.split(key, 8 + 16 * L))
    fc_w = nrm(next(keys), (H, NL))
    p = {
        "word_emb": nrm(next(keys), (cfg["vocab"], H)),
        "pos_emb": nrm(next(keys), (cfg["max_pos"], H)),
        "type_emb": nrm(next(keys), (cfg["type_vocab"], H)),
        "emb_ln_g": jnp.ones((H,), jnp.float32),
        "emb_ln_b": jnp.zeros((H,), jnp.float32),
        "pool_w": nrm(next(keys), (H, H)),
        "pool_b": jnp.zeros((H,), jnp.float32),
        # Classifier Linear(H, 6) stored lane-padded to 128 output columns so the
        # head kernel's final store is lane-dense; logits sliced back to 6 outside.
        "fc_w_pad": jnp.zeros((H, _LABEL_PAD), jnp.float32).at[:, :NL].set(fc_w),
        "fc_b_pad": jnp.zeros((_LABEL_PAD,), jnp.float32),
        "layers": [],
    }
    for _ in range(L):
        wq = nrm(next(keys), (H, H))
        wk = nrm(next(keys), (H, H))
        wv = nrm(next(keys), (H, H))
        p["layers"].append({
            # Fused Q|K|V projection -> one (H, 3H) MXU matmul per layer.
            "wqkv": jnp.concatenate([wq, wk, wv], axis=1),
            "bqkv": jnp.zeros((3 * H,), jnp.float32),
            "wo": nrm(next(keys), (H, H)), "bo": jnp.zeros((H,), jnp.float32),
            "ln1_g": jnp.ones((H,), jnp.float32), "ln1_b": jnp.zeros((H,), jnp.float32),
            "w1": nrm(next(keys), (H, I)), "b1": jnp.zeros((I,), jnp.float32),
            "w2": nrm(next(keys), (I, H)), "b2": jnp.zeros((H,), jnp.float32),
            "ln2_g": jnp.ones((H,), jnp.float32), "ln2_b": jnp.zeros((H,), jnp.float32),
        })
    return p


def bert_forward(params, ids, attention_mask, token_type_ids, cfg=CFG):
    B, S = ids.shape
    H, heads = cfg["hidden"], cfg["heads"]
    D = H // heads
    M = B * S
    eps = cfg["ln_eps"]

    # --- embeddings (gathers are XLA glue; add + LayerNorm is a Pallas kernel) ---
    we = params["word_emb"][ids]                          # (B, S, H)
    pe = params["pos_emb"][jnp.arange(S)][None, :, :]     # (1, S, H)
    te = params["type_emb"][token_type_ids]               # (B, S, H)
    x = embed_layernorm((we + pe).reshape(M, H), te.reshape(M, H),
                        params["emb_ln_g"], params["emb_ln_b"], eps)

    # HF-style extended attention mask: 0 -> -10000, 1 -> 0 (additive), shape (B, 1, S).
    add_mask = ((1.0 - attention_mask.astype(jnp.float32)) * -10000.0)[:, None, :]

    # --- transformer encoder: 2 fused pallas_calls per layer ---
    for lyr in params["layers"]:
        x = attention_block(x, lyr, add_mask, B, S, heads, D, eps)
        x = ffn_block(x, lyr, eps)

    # --- pooler + classifier (fused head kernel) ---
    cls = x.reshape(B, S, H)[:, 0, :]                     # (B, H)
    logits_pad = head_block(cls, params["pool_w"], params["pool_b"],
                            params["fc_w_pad"], params["fc_b_pad"])
    return logits_pad[:, :cfg["num_labels"]]              # (B, 6)


if __name__ == "__main__":
    key = jax.random.PRNGKey(0)
    kp, ki = jax.random.split(key, 2)

    B, S = 2, 8
    params = init_params(kp, CFG)

    ids = jax.random.randint(ki, (B, S), 0, CFG["vocab"], dtype=jnp.int32)
    attention_mask = jnp.ones((B, S), jnp.int32).at[1, 6:].set(0)        # pad last 2 tokens of sample 1
    token_type_ids = jnp.zeros((B, S), jnp.int32).at[:, S // 2:].set(1)  # second segment

    logits = jax.jit(bert_forward)(params, ids, attention_mask, token_type_ids)
    jax.block_until_ready(logits)

    assert logits.shape == (B, CFG["num_labels"])
    assert logits.dtype == jnp.float32
    print("KERNEL_OK")
</pallas_src>

<mosaic_0001>
module attributes {stable_mosaic.version = 11 : i64} {
  func.func @_emb_ln_kernel(%arg0: memref<16x128xf32, #tpu.memory_space<vmem>>, %arg1: memref<16x128xf32, #tpu.memory_space<vmem>>, %arg2: memref<1x128xf32, #tpu.memory_space<vmem>>, %arg3: memref<1x128xf32, #tpu.memory_space<vmem>>, %arg4: memref<16x128xf32, #tpu.memory_space<vmem>>) attributes {dimension_semantics = [], scalar_prefetch = 0 : i64, scratch_operands = 0 : i64, tpu.core_type = #tpu.core_type<tc>} {
    %c0 = arith.constant 0 : index
    %c0_0 = arith.constant 0 : index
    %0 = vector.load %arg0[%c0, %c0_0] : memref<16x128xf32, #tpu.memory_space<vmem>>, vector<16x128xf32>
    %c0_1 = arith.constant 0 : index
    %c0_2 = arith.constant 0 : index
    %1 = vector.load %arg1[%c0_1, %c0_2] : memref<16x128xf32, #tpu.memory_space<vmem>>, vector<16x128xf32>
    %2 = arith.addf %0, %1 : vector<16x128xf32>
    %c0_3 = arith.constant 0 : index
    %c0_4 = arith.constant 0 : index
    %3 = vector.load %arg2[%c0_3, %c0_4] : memref<1x128xf32, #tpu.memory_space<vmem>>, vector<1x128xf32>
    %c0_5 = arith.constant 0 : index
    %c0_6 = arith.constant 0 : index
    %4 = vector.load %arg3[%c0_5, %c0_6] : memref<1x128xf32, #tpu.memory_space<vmem>>, vector<1x128xf32>
    %cst = arith.constant dense<0.000000e+00> : vector<16xf32>
    %5 = vector.multi_reduction <add>, %2, %cst [1] : vector<16x128xf32> to vector<16xf32>
    %6 = vector.shape_cast %5 : vector<16xf32> to vector<16x1xf32>
    %cst_7 = arith.constant 1.280000e+02 : f32
    %7 = vector.broadcast %cst_7 : f32 to vector<16x1xf32>
    %8 = arith.divf %6, %7 : vector<16x1xf32>
    %9 = vector.broadcast %8 : vector<16x1xf32> to vector<16x128xf32>
    %10 = arith.subf %2, %9 : vector<16x128xf32>
    %11 = arith.mulf %10, %10 : vector<16x128xf32>
    %cst_8 = arith.constant dense<0.000000e+00> : vector<16xf32>
    %12 = vector.multi_reduction <add>, %11, %cst_8 [1] : vector<16x128xf32> to vector<16xf32>
    %13 = vector.shape_cast %12 : vector<16xf32> to vector<16x1xf32>
    %cst_9 = arith.constant 1.280000e+02 : f32
    %14 = vector.broadcast %cst_9 : f32 to vector<16x1xf32>
    %15 = arith.divf %13, %14 : vector<16x1xf32>
    %16 = vector.broadcast %8 : vector<16x1xf32> to vector<16x128xf32>
    %17 = arith.subf %2, %16 : vector<16x128xf32>
    %cst_10 = arith.constant 9.99999996E-13 : f32
    %18 = vector.broadcast %cst_10 : f32 to vector<16x1xf32>
    %19 = arith.addf %15, %18 : vector<16x1xf32>
    %20 = math.rsqrt %19 : vector<16x1xf32>
    %21 = vector.broadcast %20 : vector<16x1xf32> to vector<16x128xf32>
    %22 = arith.mulf %17, %21 : vector<16x128xf32>
    %23 = vector.broadcast %3 : vector<1x128xf32> to vector<16x128xf32>
    %24 = arith.mulf %22, %23 : vector<16x128xf32>
    %25 = vector.broadcast %4 : vector<1x128xf32> to vector<16x128xf32>
    %26 = arith.addf %24, %25 : vector<16x128xf32>
    %c0_11 = arith.constant 0 : index
    %c0_12 = arith.constant 0 : index
    %27 = vector.load %arg4[%c0_11, %c0_12] : memref<16x128xf32, #tpu.memory_space<vmem>>, vector<16x128xf32>
    tpu.vector_store %arg4[%c0_11, %c0_12], %26 {strides = array<i32>} : memref<16x128xf32, #tpu.memory_space<vmem>>, vector<16x128xf32>,
    return
  }
}

module attributes {stable_mosaic.version = 11 : i64} {
  func.func @_ffn_block_kernel(%arg0: memref<16x128xf32, #tpu.memory_space<vmem>>, %arg1: memref<128x512xf32, #tpu.memory_space<vmem>>, %arg2: memref<1x512xf32, #tpu.memory_space<vmem>>, %arg3: memref<512x128xf32, #tpu.memory_space<vmem>>, %arg4: memref<1x128xf32, #tpu.memory_space<vmem>>, %arg5: memref<1x128xf32, #tpu.memory_space<vmem>>, %arg6: memref<1x128xf32, #tpu.memory_space<vmem>>, %arg7: memref<16x128xf32, #tpu.memory_space<vmem>>) attributes {dimension_semantics = [], scalar_prefetch = 0 : i64, scratch_operands = 0 : i64, tpu.core_type = #tpu.core_type<tc>} {
    %c0 = arith.constant 0 : index
    %c0_0 = arith.constant 0 : index
    %0 = vector.load %arg0[%c0, %c0_0] : memref<16x128xf32, #tpu.memory_space<vmem>>, vector<16x128xf32>
    %c0_1 = arith.constant 0 : index
    %c0_2 = arith.constant 0 : index
    %1 = vector.load %arg1[%c0_1, %c0_2] : memref<128x512xf32, #tpu.memory_space<vmem>>, vector<128x512xf32>
    %2 = arith.truncf %0 : vector<16x128xf32> to vector<16x128xbf16>
    %3 = arith.truncf %1 : vector<128x512xf32> to vector<128x512xbf16>
    %cst = arith.constant dense<0.000000e+00> : vector<16x512xf32>
    %4 = tpu.matmul %2, %3, %cst {dimension_numbers = #tpu.dot_dimension_numbers<[1], [0], [0], [1], [0, 0, 1, 1], [], []>} : vector<16x128xbf16>, vector<128x512xbf16>, vector<16x512xf32> -> vector<16x512xf32>
    %c0_3 = arith.constant 0 : index
    %c0_4 = arith.constant 0 : index
    %5 = vector.load %arg2[%c0_3, %c0_4] : memref<1x512xf32, #tpu.memory_space<vmem>>, vector<1x512xf32>
    %6 = vector.broadcast %5 : vector<1x512xf32> to vector<16x512xf32>
    %7 = arith.addf %4, %6 : vector<16x512xf32>
    %cst_5 = arith.constant 5.000000e-01 : f32
    %8 = vector.broadcast %cst_5 : f32 to vector<16x512xf32>
    %9 = arith.mulf %8, %7 : vector<16x512xf32>
    %cst_6 = arith.constant 0.707106769 : f32
    %10 = vector.broadcast %cst_6 : f32 to vector<16x512xf32>
    %11 = arith.mulf %7, %10 : vector<16x512xf32>
    %12 = math.erf %11 : vector<16x512xf32>
    %cst_7 = arith.constant 1.000000e+00 : f32
    %13 = vector.broadcast %cst_7 : f32 to vector<16x512xf32>
    %14 = arith.addf %13, %12 : vector<16x512xf32>
    %15 = arith.mulf %9, %14 : vector<16x512xf32>
    %c0_8 = arith.constant 0 : index
    %c0_9 = arith.constant 0 : index
    %16 = vector.load %arg3[%c0_8, %c0_9] : memref<512x128xf32, #tpu.memory_space<vmem>>, vector<512x128xf32>
    %17 = arith.truncf %15 : vector<16x512xf32> to vector<16x512xbf16>
    %18 = arith.truncf %16 : vector<512x128xf32> to vector<512x128xbf16>
    %cst_10 = arith.constant dense<0.000000e+00> : vector<16x128xf32>
    %19 = tpu.matmul %17, %18, %cst_10 {dimension_numbers = #tpu.dot_dimension_numbers<[1], [0], [0], [1], [0, 0, 1, 1], [], []>} : vector<16x512xbf16>, vector<512x128xbf16>, vector<16x128xf32> -> vector<16x128xf32>
    %c0_11 = arith.constant 0 : index
    %c0_12 = arith.constant 0 : index
    %20 = vector.load %arg4[%c0_11, %c0_12] : memref<1x128xf32, #tpu.memory_space<vmem>>, vector<1x128xf32>
    %21 = vector.broadcast %20 : vector<1x128xf32> to vector<16x128xf32>
    %22 = arith.addf %19, %21 : vector<16x128xf32>
    %23 = arith.addf %0, %22 : vector<16x128xf32>
    %c0_13 = arith.constant 0 : index
    %c0_14 = arith.constant 0 : index
    %24 = vector.load %arg5[%c0_13, %c0_14] : memref<1x128xf32, #tpu.memory_space<vmem>>, vector<1x128xf32>
    %c0_15 = arith.constant 0 : index
    %c0_16 = arith.constant 0 : index
    %25 = vector.load %arg6[%c0_15, %c0_16] : memref<1x128xf32, #tpu.memory_space<vmem>>, vector<1x128xf32>
    %cst_17 = arith.constant dense<0.000000e+00> : vector<16xf32>
    %26 = vector.multi_reduction <add>, %23, %cst_17 [1] : vector<16x128xf32> to vector<16xf32>
    %27 = vector.shape_cast %26 : vector<16xf32> to vector<16x1xf32>
    %cst_18 = arith.constant 1.280000e+02 : f32
    %28 = vector.broadcast %cst_18 : f32 to vector<16x1xf32>
    %29 = arith.divf %27, %28 : vector<16x1xf32>
    %30 = vector.broadcast %29 : vector<16x1xf32> to vector<16x128xf32>
    %31 = arith.subf %23, %30 : vector<16x128xf32>
    %32 = arith.mulf %31, %31 : vector<16x128xf32>
    %cst_19 = arith.constant dense<0.000000e+00> : vector<16xf32>
    %33 = vector.multi_reduction <add>, %32, %cst_19 [1] : vector<16x128xf32> to vector<16xf32>
    %34 = vector.shape_cast %33 : vector<16xf32> to vector<16x1xf32>
    %cst_20 = arith.constant 1.280000e+02 : f32
    %35 = vector.broadcast %cst_20 : f32 to vector<16x1xf32>
    %36 = arith.divf %34, %35 : vector<16x1xf32>
    %37 = vector.broadcast %29 : vector<16x1xf32> to vector<16x128xf32>
    %38 = arith.subf %23, %37 : vector<16x128xf32>
    %cst_21 = arith.constant 9.99999996E-13 : f32
    %39 = vector.broadcast %cst_21 : f32 to vector<16x1xf32>
    %40 = arith.addf %36, %39 : vector<16x1xf32>
    %41 = math.rsqrt %40 : vector<16x1xf32>
    %42 = vector.broadcast %41 : vector<16x1xf32> to vector<16x128xf32>
    %43 = arith.mulf %38, %42 : vector<16x128xf32>
    %44 = vector.broadcast %24 : vector<1x128xf32> to vector<16x128xf32>
    %45 = arith.mulf %43, %44 : vector<16x128xf32>
    %46 = vector.broadcast %25 : vector<1x128xf32> to vector<16x128xf32>
    %47 = arith.addf %45, %46 : vector<16x128xf32>
    %c0_22 = arith.constant 0 : index
    %c0_23 = arith.constant 0 : index
    %48 = vector.load %arg7[%c0_22, %c0_23] : memref<16x128xf32, #tpu.memory_space<vmem>>, vector<16x128xf32>
    tpu.vector_store %arg7[%c0_22, %c0_23], %47 {strides = array<i32>} : memref<16x128xf32, #tpu.memory_space<vmem>>, vector<16x128xf32>,
    return
  }
}

module attributes {stable_mosaic.version = 11 : i64} {
  func.func @_head_kernel(%arg0: memref<2x128xf32, #tpu.memory_space<vmem>>, %arg1: memref<128x128xf32, #tpu.memory_space<vmem>>, %arg2: memref<1x128xf32, #tpu.memory_space<vmem>>, %arg3: memref<128x128xf32, #tpu.memory_space<vmem>>, %arg4: memref<1x128xf32, #tpu.memory_space<vmem>>, %arg5: memref<2x128xf32, #tpu.memory_space<vmem>>) attributes {dimension_semantics = [], scalar_prefetch = 0 : i64, scratch_operands = 0 : i64, tpu.core_type = #tpu.core_type<tc>} {
    %c0 = arith.constant 0 : index
    %c0_0 = arith.constant 0 : index
    %0 = vector.load %arg0[%c0, %c0_0] : memref<2x128xf32, #tpu.memory_space<vmem>>, vector<2x128xf32>
    %c0_1 = arith.constant 0 : index
    %c0_2 = arith.constant 0 : index
    %1 = vector.load %arg1[%c0_1, %c0_2] : memref<128x128xf32, #tpu.memory_space<vmem>>, vector<128x128xf32>
    %2 = arith.truncf %0 : vector<2x128xf32> to vector<2x128xbf16>
    %3 = arith.truncf %1 : vector<128x128xf32> to vector<128x128xbf16>
    %cst = arith.constant dense<0.000000e+00> : vector<2x128xf32>
    %4 = tpu.matmul %2, %3, %cst {dimension_numbers = #tpu.dot_dimension_numbers<[1], [0], [0], [1], [0, 0, 1, 1], [], []>} : vector<2x128xbf16>, vector<128x128xbf16>, vector<2x128xf32> -> vector<2x128xf32>
    %c0_3 = arith.constant 0 : index
    %c0_4 = arith.constant 0 : index
    %5 = vector.load %arg2[%c0_3, %c0_4] : memref<1x128xf32, #tpu.memory_space<vmem>>, vector<1x128xf32>
    %6 = vector.broadcast %5 : vector<1x128xf32> to vector<2x128xf32>
    %7 = arith.addf %4, %6 : vector<2x128xf32>
    %8 = math.tanh %7 : vector<2x128xf32>
    %c0_5 = arith.constant 0 : index
    %c0_6 = arith.constant 0 : index
    %9 = vector.load %arg3[%c0_5, %c0_6] : memref<128x128xf32, #tpu.memory_space<vmem>>, vector<128x128xf32>
    %10 = arith.truncf %8 : vector<2x128xf32> to vector<2x128xbf16>
    %11 = arith.truncf %9 : vector<128x128xf32> to vector<128x128xbf16>
    %cst_7 = arith.constant dense<0.000000e+00> : vector<2x128xf32>
    %12 = tpu.matmul %10, %11, %cst_7 {dimension_numbers = #tpu.dot_dimension_numbers<[1], [0], [0], [1], [0, 0, 1, 1], [], []>} : vector<2x128xbf16>, vector<128x128xbf16>, vector<2x128xf32> -> vector<2x128xf32>
    %c0_8 = arith.constant 0 : index
    %c0_9 = arith.constant 0 : index
    %13 = vector.load %arg4[%c0_8, %c0_9] : memref<1x128xf32, #tpu.memory_space<vmem>>, vector<1x128xf32>
    %14 = vector.broadcast %13 : vector<1x128xf32> to vector<2x128xf32>
    %15 = arith.addf %12, %14 : vector<2x128xf32>
    %c0_10 = arith.constant 0 : index
    %c0_11 = arith.constant 0 : index
    %16 = vector.load %arg5[%c0_10, %c0_11] : memref<2x128xf32, #tpu.memory_space<vmem>>, vector<2x128xf32>
    tpu.vector_store %arg5[%c0_10, %c0_11], %15 {strides = array<i32>} : memref<2x128xf32, #tpu.memory_space<vmem>>, vector<2x128xf32>,
    return
  }
}

module attributes {stable_mosaic.version = 11 : i64} {
  func.func @_attn_block_kernel(%arg0: memref<16x128xf32, #tpu.memory_space<vmem>>, %arg1: memref<128x384xf32, #tpu.memory_space<vmem>>, %arg2: memref<1x384xf32, #tpu.memory_space<vmem>>, %arg3: memref<128x128xf32, #tpu.memory_space<vmem>>, %arg4: memref<1x128xf32, #tpu.memory_space<vmem>>, %arg5: memref<1x128xf32, #tpu.memory_space<vmem>>, %arg6: memref<1x128xf32, #tpu.memory_space<vmem>>, %arg7: memref<2x1x8xf32, #tpu.memory_space<vmem>>, %arg8: memref<16x128xf32, #tpu.memory_space<vmem>>) attributes {dimension_semantics = [], scalar_prefetch = 0 : i64, scratch_operands = 0 : i64, tpu.core_type = #tpu.core_type<tc>} {
    %c0 = arith.constant 0 : index
    %c0_0 = arith.constant 0 : index
    %0 = vector.load %arg0[%c0, %c0_0] : memref<16x128xf32, #tpu.memory_space<vmem>>, vector<16x128xf32>
    %c0_1 = arith.constant 0 : index
    %c0_2 = arith.constant 0 : index
    %1 = vector.load %arg1[%c0_1, %c0_2] : memref<128x384xf32, #tpu.memory_space<vmem>>, vector<128x384xf32>
    %2 = arith.truncf %0 : vector<16x128xf32> to vector<16x128xbf16>
    %3 = arith.truncf %1 : vector<128x384xf32> to vector<128x384xbf16>
    %cst = arith.constant dense<0.000000e+00> : vector<16x384xf32>
    %4 = tpu.matmul %2, %3, %cst {dimension_numbers = #tpu.dot_dimension_numbers<[1], [0], [0], [1], [0, 0, 1, 1], [], []>} : vector<16x128xbf16>, vector<128x384xbf16>, vector<16x384xf32> -> vector<16x384xf32>
    %c0_3 = arith.constant 0 : index
    %c0_4 = arith.constant 0 : index
    %5 = vector.load %arg2[%c0_3, %c0_4] : memref<1x384xf32, #tpu.memory_space<vmem>>, vector<1x384xf32>
    %6 = vector.broadcast %5 : vector<1x384xf32> to vector<16x384xf32>
    %7 = arith.addf %4, %6 : vector<16x384xf32>
    %c0_5 = arith.constant 0 : index
    %c0_6 = arith.constant 0 : index
    %c0_7 = arith.constant 0 : index
    %8 = vector.load %arg7[%c0_5, %c0_6, %c0_7] : memref<2x1x8xf32, #tpu.memory_space<vmem>>, vector<2x1x8xf32>
    %9 = vector.extract_strided_slice %7 {offsets = [0, 0], sizes = [16, 32], strides = [1, 1]} : vector<16x384xf32> to vector<16x32xf32>
    %10 = vector.shape_cast %9 : vector<16x32xf32> to vector<2x8x32xf32>
    %11 = vector.extract_strided_slice %7 {offsets = [0, 128], sizes = [16, 32], strides = [1, 1]} : vector<16x384xf32> to vector<16x32xf32>
    %12 = vector.shape_cast %11 : vector<16x32xf32> to vector<2x8x32xf32>
    %13 = vector.extract_strided_slice %7 {offsets = [0, 256], sizes = [16, 32], strides = [1, 1]} : vector<16x384xf32> to vector<16x32xf32>
    %14 = vector.shape_cast %13 : vector<16x32xf32> to vector<2x8x32xf32>
    %15 = arith.truncf %10 : vector<2x8x32xf32> to vector<2x8x32xbf16>
    %16 = arith.truncf %12 : vector<2x8x32xf32> to vector<2x8x32xbf16>
    "tpu.trace_start"() <{level = 10 : i32, message = "bqd,bkd->bqk"}> : () -> ()
    %cst_8 = arith.constant dense<0.000000e+00> : vector<2x8x8xf32>
    %17 = tpu.matmul %15, %16, %cst_8 {dimension_numbers = #tpu.dot_dimension_numbers<[2], [2], [1], [1], [0, 0, 0, 1, 1, 1], [0], [0]>} : vector<2x8x32xbf16>, vector<2x8x32xbf16>, vector<2x8x8xf32> -> vector<2x8x8xf32>
    "tpu.trace_stop"() : () -> ()
    %cst_9 = arith.constant 0.176776692 : f32
    %18 = vector.broadcast %cst_9 : f32 to vector<2x8x8xf32>
    %19 = arith.mulf %17, %18 : vector<2x8x8xf32>
    %20 = vector.broadcast %8 : vector<2x1x8xf32> to vector<2x8x8xf32>
    %21 = arith.addf %19, %20 : vector<2x8x8xf32>
    %cst_10 = arith.constant dense<0xFF800000> : vector<2x8xf32>
    %22 = vector.multi_reduction <maximumf>, %21, %cst_10 [2] : vector<2x8x8xf32> to vector<2x8xf32>
    %23 = vector.shape_cast %22 : vector<2x8xf32> to vector<2x8x1xf32>
    %24 = vector.broadcast %23 : vector<2x8x1xf32> to vector<2x8x8xf32>
    %25 = arith.subf %21, %24 : vector<2x8x8xf32>
    %26 = math.exp %25 : vector<2x8x8xf32>
    %cst_11 = arith.constant dense<0.000000e+00> : vector<2x8xf32>
    %27 = vector.multi_reduction <add>, %26, %cst_11 [2] : vector<2x8x8xf32> to vector<2x8xf32>
    %28 = vector.shape_cast %27 : vector<2x8xf32> to vector<2x8x1xf32>
    %29 = vector.broadcast %28 : vector<2x8x1xf32> to vector<2x8x8xf32>
    %30 = arith.divf %26, %29 : vector<2x8x8xf32>
    %31 = arith.truncf %30 : vector<2x8x8xf32> to vector<2x8x8xbf16>
    %32 = arith.truncf %14 : vector<2x8x32xf32> to vector<2x8x32xbf16>
    "tpu.trace_start"() <{level = 10 : i32, message = "bqk,bkd->bqd"}> : () -> ()
    %cst_12 = arith.constant dense<0.000000e+00> : vector<2x8x32xf32>
    %33 = tpu.matmul %31, %32, %cst_12 {dimension_numbers = #tpu.dot_dimension_numbers<[2], [1], [1], [2], [0, 0, 0, 1, 1, 2], [0], [0]>} : vector<2x8x8xbf16>, vector<2x8x32xbf16>, vector<2x8x32xf32> -> vector<2x8x32xf32>
    "tpu.trace_stop"() : () -> ()
    %34 = vector.shape_cast %33 : vector<2x8x32xf32> to vector<16x32xf32>
    %35 = vector.extract_strided_slice %7 {offsets = [0, 32], sizes = [16, 32], strides = [1, 1]} : vector<16x384xf32> to vector<16x32xf32>
    %36 = vector.shape_cast %35 : vector<16x32xf32> to vector<2x8x32xf32>
    %37 = vector.extract_strided_slice %7 {offsets = [0, 160], sizes = [16, 32], strides = [1, 1]} : vector<16x384xf32> to vector<16x32xf32>
    %38 = vector.shape_cast %37 : vector<16x32xf32> to vector<2x8x32xf32>
    %39 = vector.extract_strided_slice %7 {offsets = [0, 288], sizes = [16, 32], strides = [1, 1]} : vector<16x384xf32> to vector<16x32xf32>
    %40 = vector.shape_cast %39 : vector<16x32xf32> to vector<2x8x32xf32>
    %41 = arith.truncf %36 : vector<2x8x32xf32> to vector<2x8x32xbf16>
    %42 = arith.truncf %38 : vector<2x8x32xf32> to vector<2x8x32xbf16>
    "tpu.trace_start"() <{level = 10 : i32, message = "bqd,bkd->bqk"}> : () -> ()
    %cst_13 = arith.constant dense<0.000000e+00> : vector<2x8x8xf32>
    %43 = tpu.matmul %41, %42, %cst_13 {dimension_numbers = #tpu.dot_dimension_numbers<[2], [2], [1], [1], [0, 0, 0, 1, 1, 1], [0], [0]>} : vector<2x8x32xbf16>, vector<2x8x32xbf16>, vector<2x8x8xf32> -> vector<2x8x8xf32>
    "tpu.trace_stop"() : () -> ()
    %cst_14 = arith.constant 0.176776692 : f32
    %44 = vector.broadcast %cst_14 : f32 to vector<2x8x8xf32>
    %45 = arith.mulf %43, %44 : vector<2x8x8xf32>
    %46 = vector.broadcast %8 : vector<2x1x8xf32> to vector<2x8x8xf32>
    %47 = arith.addf %45, %46 : vector<2x8x8xf32>
    %cst_15 = arith.constant dense<0xFF800000> : vector<2x8xf32>
    %48 = vector.multi_reduction <maximumf>, %47, %cst_15 [2] : vector<2x8x8xf32> to vector<2x8xf32>
    %49 = vector.shape_cast %48 : vector<2x8xf32> to vector<2x8x1xf32>
    %50 = vector.broadcast %49 : vector<2x8x1xf32> to vector<2x8x8xf32>
    %51 = arith.subf %47, %50 : vector<2x8x8xf32>
    %52 = math.exp %51 : vector<2x8x8xf32>
    %cst_16 = arith.constant dense<0.000000e+00> : vector<2x8xf32>
    %53 = vector.multi_reduction <add>, %52, %cst_16 [2] : vector<2x8x8xf32> to vector<2x8xf32>
    %54 = vector.shape_cast %53 : vector<2x8xf32> to vector<2x8x1xf32>
    %55 = vector.broadcast %54 : vector<2x8x1xf32> to vector<2x8x8xf32>
    %56 = arith.divf %52, %55 : vector<2x8x8xf32>
    %57 = arith.truncf %56 : vector<2x8x8xf32> to vector<2x8x8xbf16>
    %58 = arith.truncf %40 : vector<2x8x32xf32> to vector<2x8x32xbf16>
    "tpu.trace_start"() <{level = 10 : i32, message = "bqk,bkd->bqd"}> : () -> ()
    %cst_17 = arith.constant dense<0.000000e+00> : vector<2x8x32xf32>
    %59 = tpu.matmul %57, %58, %cst_17 {dimension_numbers = #tpu.dot_dimension_numbers<[2], [1], [1], [2], [0, 0, 0, 1, 1, 2], [0], [0]>} : vector<2x8x8xbf16>, vector<2x8x32xbf16>, vector<2x8x32xf32> -> vector<2x8x32xf32>
    "tpu.trace_stop"() : () -> ()
    %60 = vector.shape_cast %59 : vector<2x8x32xf32> to vector<16x32xf32>
    %61 = vector.extract_strided_slice %7 {offsets = [0, 64], sizes = [16, 32], strides = [1, 1]} : vector<16x384xf32> to vector<16x32xf32>
    %62 = vector.shape_cast %61 : vector<16x32xf32> to vector<2x8x32xf32>
    %63 = vector.extract_strided_slice %7 {offsets = [0, 192], sizes = [16, 32], strides = [1, 1]} : vector<16x384xf32> to vector<16x32xf32>
    %64 = vector.shape_cast %63 : vector<16x32xf32> to vector<2x8x32xf32>
    %65 = vector.extract_strided_slice %7 {offsets = [0, 320], sizes = [16, 32], strides = [1, 1]} : vector<16x384xf32> to vector<16x32xf32>
    %66 = vector.shape_cast %65 : vector<16x32xf32> to vector<2x8x32xf32>
    %67 = arith.truncf %62 : vector<2x8x32xf32> to vector<2x8x32xbf16>
    %68 = arith.truncf %64 : vector<2x8x32xf32> to vector<2x8x32xbf16>
    "tpu.trace_start"() <{level = 10 : i32, message = "bqd,bkd->bqk"}> : () -> ()
    %cst_18 = arith.constant dense<0.000000e+00> : vector<2x8x8xf32>
    %69 = tpu.matmul %67, %68, %cst_18 {dimension_numbers = #tpu.dot_dimension_numbers<[2], [2], [1], [1], [0, 0, 0, 1, 1, 1], [0], [0]>} : vector<2x8x32xbf16>, vector<2x8x32xbf16>, vector<2x8x8xf32> -> vector<2x8x8xf32>
    "tpu.trace_stop"() : () -> ()
    %cst_19 = arith.constant 0.176776692 : f32
    %70 = vector.broadcast %cst_19 : f32 to vector<2x8x8xf32>
    %71 = arith.mulf %69, %70 : vector<2x8x8xf32>
    %72 = vector.broadcast %8 : vector<2x1x8xf32> to vector<2x8x8xf32>
    %73 = arith.addf %71, %72 : vector<2x8x8xf32>
    %cst_20 = arith.constant dense<0xFF800000> : vector<2x8xf32>
    %74 = vector.multi_reduction <maximumf>, %73, %cst_20 [2] : vector<2x8x8xf32> to vector<2x8xf32>
    %75 = vector.shape_cast %74 : vector<2x8xf32> to vector<2x8x1xf32>
    %76 = vector.broadcast %75 : vector<2x8x1xf32> to vector<2x8x8xf32>
    %77 = arith.subf %73, %76 : vector<2x8x8xf32>
    %78 = math.exp %77 : vector<2x8x8xf32>
    %cst_21 = arith.constant dense<0.000000e+00> : vector<2x8xf32>
    %79 = vector.multi_reduction <add>, %78, %cst_21 [2] : vector<2x8x8xf32> to vector<2x8xf32>
    %80 = vector.shape_cast %79 : vector<2x8xf32> to vector<2x8x1xf32>
    %81 = vector.broadcast %80 : vector<2x8x1xf32> to vector<2x8x8xf32>
    %82 = arith.divf %78, %81 : vector<2x8x8xf32>
    %83 = arith.truncf %82 : vector<2x8x8xf32> to vector<2x8x8xbf16>
    %84 = arith.truncf %66 : vector<2x8x32xf32> to vector<2x8x32xbf16>
    "tpu.trace_start"() <{level = 10 : i32, message = "bqk,bkd->bqd"}> : () -> ()
    %cst_22 = arith.constant dense<0.000000e+00> : vector<2x8x32xf32>
    %85 = tpu.matmul %83, %84, %cst_22 {dimension_numbers = #tpu.dot_dimension_numbers<[2], [1], [1], [2], [0, 0, 0, 1, 1, 2], [0], [0]>} : vector<2x8x8xbf16>, vector<2x8x32xbf16>, vector<2x8x32xf32> -> vector<2x8x32xf32>
    "tpu.trace_stop"() : () -> ()
    %86 = vector.shape_cast %85 : vector<2x8x32xf32> to vector<16x32xf32>
    %87 = vector.extract_strided_slice %7 {offsets = [0, 96], sizes = [16, 32], strides = [1, 1]} : vector<16x384xf32> to vector<16x32xf32>
    %88 = vector.shape_cast %87 : vector<16x32xf32> to vector<2x8x32xf32>
    %89 = vector.extract_strided_slice %7 {offsets = [0, 224], sizes = [16, 32], strides = [1, 1]} : vector<16x384xf32> to vector<16x32xf32>
    %90 = vector.shape_cast %89 : vector<16x32xf32> to vector<2x8x32xf32>
    %91 = vector.extract_strided_slice %7 {offsets = [0, 352], sizes = [16, 32], strides = [1, 1]} : vector<16x384xf32> to vector<16x32xf32>
    %92 = vector.shape_cast %91 : vector<16x32xf32> to vector<2x8x32xf32>
    %93 = arith.truncf %88 : vector<2x8x32xf32> to vector<2x8x32xbf16>
    %94 = arith.truncf %90 : vector<2x8x32xf32> to vector<2x8x32xbf16>
    "tpu.trace_start"() <{level = 10 : i32, message = "bqd,bkd->bqk"}> : () -> ()
    %cst_23 = arith.constant dense<0.000000e+00> : vector<2x8x8xf32>
    %95 = tpu.matmul %93, %94, %cst_23 {dimension_numbers = #tpu.dot_dimension_numbers<[2], [2], [1], [1], [0, 0, 0, 1, 1, 1], [0], [0]>} : vector<2x8x32xbf16>, vector<2x8x32xbf16>, vector<2x8x8xf32> -> vector<2x8x8xf32>
    "tpu.trace_stop"() : () -> ()
    %cst_24 = arith.constant 0.176776692 : f32
    %96 = vector.broadcast %cst_24 : f32 to vector<2x8x8xf32>
    %97 = arith.mulf %95, %96 : vector<2x8x8xf32>
    %98 = vector.broadcast %8 : vector<2x1x8xf32> to vector<2x8x8xf32>
    %99 = arith.addf %97, %98 : vector<2x8x8xf32>
    %cst_25 = arith.constant dense<0xFF800000> : vector<2x8xf32>
    %100 = vector.multi_reduction <maximumf>, %99, %cst_25 [2] : vector<2x8x8xf32> to vector<2x8xf32>
    %101 = vector.shape_cast %100 : vector<2x8xf32> to vector<2x8x1xf32>
    %102 = vector.broadcast %101 : vector<2x8x1xf32> to vector<2x8x8xf32>
    %103 = arith.subf %99, %102 : vector<2x8x8xf32>
    %104 = math.exp %103 : vector<2x8x8xf32>
    %cst_26 = arith.constant dense<0.000000e+00> : vector<2x8xf32>
    %105 = vector.multi_reduction <add>, %104, %cst_26 [2] : vector<2x8x8xf32> to vector<2x8xf32>
    %106 = vector.shape_cast %105 : vector<2x8xf32> to vector<2x8x1xf32>
    %107 = vector.broadcast %106 : vector<2x8x1xf32> to vector<2x8x8xf32>
    %108 = arith.divf %104, %107 : vector<2x8x8xf32>
    %109 = arith.truncf %108 : vector<2x8x8xf32> to vector<2x8x8xbf16>
    %110 = arith.truncf %92 : vector<2x8x32xf32> to vector<2x8x32xbf16>
    "tpu.trace_start"() <{level = 10 : i32, message = "bqk,bkd->bqd"}> : () -> ()
    %cst_27 = arith.constant dense<0.000000e+00> : vector<2x8x32xf32>
    %111 = tpu.matmul %109, %110, %cst_27 {dimension_numbers = #tpu.dot_dimension_numbers<[2], [1], [1], [2], [0, 0, 0, 1, 1, 2], [0], [0]>} : vector<2x8x8xbf16>, vector<2x8x32xbf16>, vector<2x8x32xf32> -> vector<2x8x32xf32>
    "tpu.trace_stop"() : () -> ()
    %112 = vector.shape_cast %111 : vector<2x8x32xf32> to vector<16x32xf32>
    %113 = tpu.concatenate %34, %60, %86, %112 in 1 : vector<16x32xf32>, vector<16x32xf32>, vector<16x32xf32>, vector<16x32xf32> -> vector<16x128xf32>
    %c0_28 = arith.constant 0 : index
    %c0_29 = arith.constant 0 : index
    %114 = vector.load %arg3[%c0_28, %c0_29] : memref<128x128xf32, #tpu.memory_space<vmem>>, vector<128x128xf32>
    %115 = arith.truncf %113 : vector<16x128xf32> to vector<16x128xbf16>
    %116 = arith.truncf %114 : vector<128x128xf32> to vector<128x128xbf16>
    %cst_30 = arith.constant dense<0.000000e+00> : vector<16x128xf32>
    %117 = tpu.matmul %115, %116, %cst_30 {dimension_numbers = #tpu.dot_dimension_numbers<[1], [0], [0], [1], [0, 0, 1, 1], [], []>} : vector<16x128xbf16>, vector<128x128xbf16>, vector<16x128xf32> -> vector<16x128xf32>
    %c0_31 = arith.constant 0 : index
    %c0_32 = arith.constant 0 : index
    %118 = vector.load %arg4[%c0_31, %c0_32] : memref<1x128xf32, #tpu.memory_space<vmem>>, vector<1x128xf32>
    %119 = vector.broadcast %118 : vector<1x128xf32> to vector<16x128xf32>
    %120 = arith.addf %117, %119 : vector<16x128xf32>
    %121 = arith.addf %0, %120 : vector<16x128xf32>
    %c0_33 = arith.constant 0 : index
    %c0_34 = arith.constant 0 : index
    %122 = vector.load %arg5[%c0_33, %c0_34] : memref<1x128xf32, #tpu.memory_space<vmem>>, vector<1x128xf32>
    %c0_35 = arith.constant 0 : index
    %c0_36 = arith.constant 0 : index
    %123 = vector.load %arg6[%c0_35, %c0_36] : memref<1x128xf32, #tpu.memory_space<vmem>>, vector<1x128xf32>
    %cst_37 = arith.constant dense<0.000000e+00> : vector<16xf32>
    %124 = vector.multi_reduction <add>, %121, %cst_37 [1] : vector<16x128xf32> to vector<16xf32>
    %125 = vector.shape_cast %124 : vector<16xf32> to vector<16x1xf32>
    %cst_38 = arith.constant 1.280000e+02 : f32
    %126 = vector.broadcast %cst_38 : f32 to vector<16x1xf32>
    %127 = arith.divf %125, %126 : vector<16x1xf32>
    %128 = vector.broadcast %127 : vector<16x1xf32> to vector<16x128xf32>
    %129 = arith.subf %121, %128 : vector<16x128xf32>
    %130 = arith.mulf %129, %129 : vector<16x128xf32>
    %cst_39 = arith.constant dense<0.000000e+00> : vector<16xf32>
    %131 = vector.multi_reduction <add>, %130, %cst_39 [1] : vector<16x128xf32> to vector<16xf32>
    %132 = vector.shape_cast %131 : vector<16xf32> to vector<16x1xf32>
    %cst_40 = arith.constant 1.280000e+02 : f32
    %133 = vector.broadcast %cst_40 : f32 to vector<16x1xf32>
    %134 = arith.divf %132, %133 : vector<16x1xf32>
    %135 = vector.broadcast %127 : vector<16x1xf32> to vector<16x128xf32>
    %136 = arith.subf %121, %135 : vector<16x128xf32>
    %cst_41 = arith.constant 9.99999996E-13 : f32
    %137 = vector.broadcast %cst_41 : f32 to vector<16x1xf32>
    %138 = arith.addf %134, %137 : vector<16x1xf32>
    %139 = math.rsqrt %138 : vector<16x1xf32>
    %140 = vector.broadcast %139 : vector<16x1xf32> to vector<16x128xf32>
    %141 = arith.mulf %136, %140 : vector<16x128xf32>
    %142 = vector.broadcast %122 : vector<1x128xf32> to vector<16x128xf32>
    %143 = arith.mulf %141, %142 : vector<16x128xf32>
    %144 = vector.broadcast %123 : vector<1x128xf32> to vector<16x128xf32>
    %145 = arith.addf %143, %144 : vector<16x128xf32>
    %c0_42 = arith.constant 0 : index
    %c0_43 = arith.constant 0 : index
    %146 = vector.load %arg8[%c0_42, %c0_43] : memref<16x128xf32, #tpu.memory_space<vmem>>, vector<16x128xf32>
    tpu.vector_store %arg8[%c0_42, %c0_43], %145 {strides = array<i32>} : memref<16x128xf32, #tpu.memory_space<vmem>>, vector<16x128xf32>,
    return
  }
}

</mosaic_0001>

<bundles_post_ra>
// kernel: bert_forward.6
= control target key start
LH: loop header
LB: loop body
LE: loop exit
PB: predicated region body
PF: predicated region fallthrough
CT: control target
= control target key end

     0   :  { %v97_v6 = vmov 128.0   ;;  %s147_s0 = inlined_call_operand.vmem [shape: f32[16,128], index: 0, kind: input, shape index: {}]   ;;  %s148_s1 = inlined_call_operand.vmem [shape: f32[16,128], index: 1, kind: input, shape index: {}]   ;;  %s149_s2 = inlined_call_operand.vmem [shape: f32[1,128], index: 2, kind: input, shape index: {}]   ;;  %s150_s3 = inlined_call_operand.vmem [shape: f32[1,128], index: 3, kind: input, shape index: {}]   ;;  %s151_s4 = inlined_call_operand.vmem [shape: f32[16,128], index: 4, kind: output, shape index: {}]  }
   0x1   :  { %v17_v0 = vld [vmem:[%s147_s0] sm:$0xff]  ;;  %v18_v3 = vld [vmem:[%s147_s0 + $0x8] sm:$0xff]  ;;  %91 = vrcp.f32 %v97_v6 }
   0x2   :  { %v19_v1 = vld [vmem:[%s148_s1] sm:$0xff]  ;;  %v20_v4 = vld [vmem:[%s148_s1 + $0x8] sm:$0xff] }
   0x3   :  { %v21_v2 = vadd.f32 %v19_v1, %v17_v0  ;;  %v22_v5 = vadd.f32 %v20_v4, %v18_v3  ;;  %v89_v35 = vld [vmem:[%s149_s2] ss:$0 sm:$0xff] }
   0x4   :  { %v90_v38 = vld [vmem:[%s150_s3] ss:$0 sm:$0xff] }
   0x5   :  { %25 = vadd.xlane.f32.xlu0 %v21_v2 }
   0x7   :  { %v92_v7 = vpop.eup %91 }
   0x8   :  { %v30_v8 = vmul.f32 128.0, %v92_v7  ;;  %vm34_vm0 = vweird.f32 %v92_v7 }
   0xa   :  { %v31_v9 = vsub.f32 1.0, %v30_v8 }
   0xc   :  { %v32_v10 = vmul.f32 %v92_v7, %v31_v9 }
   0xd   :  { %27 = vadd.xlane.f32.xlu0 %v22_v5 }
   0xe   :  { %v33_v11 = vadd.f32 %v92_v7, %v32_v10 }
  0x10   :  { %v35_v12 = vsel %vm34_vm0, %v92_v7, %v33_v11 }
  0x78   :  { %v26_v13 = vpop.xlane.xlu0 %25 }
  0x79   :  { %v36_v14 = vmul.f32 %v35_v12, %v26_v13 }
  0x7b   :  { %v38_v15 = vsub.f32 %v21_v2, %v36_v14 }
  0x7d   :  { %v40_v16 = vmul.f32 %v38_v15, %v38_v15 }
  0x7f   :  { %42 = vadd.xlane.f32.xlu1 %v40_v16 }
  0x80   :  { %v28_v17 = vpop.xlane.xlu0 %27 }
  0x81   :  { %v37_v18 = vmul.f32 %v35_v12, %v28_v17 }
  0x83   :  { %v39_v19 = vsub.f32 %v22_v5, %v37_v18 }
  0x85   :  { %v41_v20 = vmul.f32 %v39_v19, %v39_v19 }
  0x87   :  { %44 = vadd.xlane.f32.xlu1 %v41_v20 }
  0xf2   :  { %v43_v21 = vpop.xlane.xlu1 %42 }
  0xf3   :  { %v46_v22 = vmul.f32 %v43_v21, %v35_v12 }
  0xf5   :  { %v48_v23 = vadd.f32 1e-12, %v46_v22 }
  0xf7   :  { %93 = vrsqrt.f32 %v48_v23  ;;  %vm56_vm2 = vweird.f32 %v48_v23 }
  0xfa   :  { %v45_v24 = vpop.xlane.xlu1 %44 }
  0xfb   :  { %v47_v25 = vmul.f32 %v45_v24, %v35_v12 }
  0xfd   :  { %v94_v26 = vpop.eup %93  ;;  %v49_v27 = vadd.f32 1e-12, %v47_v25 }
  0xfe   :  { %v51_v28 = vmul.f32 %v94_v26, %v48_v23  ;;  %vm57_vm1 = vweird.f32 %v94_v26 }
  0xff   :  { %95 = vrsqrt.f32 %v49_v27  ;;  %vm58_vm3 = vmor %vm56_vm2, %vm57_vm1  ;;  %vm66_vm5 = vweird.f32 %v49_v27 }
 0x100   :  { %v52_v29 = vmul.f32 %v94_v26, %v51_v28 }
 0x102   :  { %v53_v30 = vmul.f32 0.5, %v52_v29 }
 0x104   :  { %v54_v31 = vsub.f32 1.5, %v53_v30 }
 0x105   :  { %v96_v32 = vpop.eup %95 }
 0x106   :  { %v55_v33 = vmul.f32 %v94_v26, %v54_v31  ;;  %v61_v34 = vmul.f32 %v96_v32, %v49_v27  ;;  %vm67_vm4 = vweird.f32 %v96_v32 }
 0x107   :  { %vm68_vm6 = vmor %vm66_vm5, %vm67_vm4 }
 0x108   :  { %v59_v36 = vsel %vm58_vm3, %v94_v26, %v55_v33  ;;  %v62_v37 = vmul.f32 %v96_v32, %v61_v34 }
 0x109   :  { %v70_v39 = vmul.f32 %v59_v36, %v38_v15 }
 0x10a   :  { %v63_v40 = vmul.f32 0.5, %v62_v37 }
 0x10b   :  { %v75_v41 = vmul.f32 %v89_v35, %v70_v39 }
 0x10c   :  { %v64_v42 = vsub.f32 1.5, %v63_v40 }
 0x10d   :  { %v80_v43 = vadd.f32 %v90_v38, %v75_v41 }
 0x10e   :  { %v65_v44 = vmul.f32 %v96_v32, %v64_v42 }
 0x10f   :  { %82 = vst [vmem:[%s151_s4] sm:$0xff] %v80_v43 }
 0x110   :  { %v69_v45 = vsel %vm68_vm6, %v96_v32, %v65_v44 }
 0x111   :  { %v71_v46 = vmul.f32 %v69_v45, %v39_v19 }
 0x113   :  { %v76_v47 = vmul.f32 %v89_v35, %v71_v46 }
 0x115   :  { %v81_v48 = vadd.f32 %v90_v38, %v76_v47 }
 0x117   :  { %83 = vst [vmem:[%s151_s4 + $0x8] sm:$0xff] %v81_v48 }

// kernel: bert_forward.11
= control target key start
LH: loop header
LB: loop body
LE: loop exit
PB: predicated region body
PF: predicated region fallthrough
CT: control target
= control target key end

     0   :  { %10 = vsyncpa [#allocation3], 0  ;;  %s298_s0 = inlined_call_operand.vmem [shape: f32[2,128], index: 0, kind: input, shape index: {}]   ;;  %s299_s1 = inlined_call_operand.hbm [shape: f32[128,128], index: 1, kind: input, shape index: {}]   ;;  %s300_s2 = inlined_call_operand.vmem [shape: f32[1,128], index: 2, kind: input, shape index: {}]   ;;  %s301_s3 = inlined_call_operand.hbm [shape: f32[128,128], index: 3, kind: input, shape index: {}]   ;;  %s302_s4 = inlined_call_operand.vmem [shape: f32[1,128], index: 4, kind: input, shape index: {}]   ;;  %s303_s5 = inlined_call_operand.hbm [shape: f32[2,128], index: 5, kind: output, shape index: {}]  }
   0x1   :  { %11 = vsyncpa [#allocation6], 0 }
   0x2   :  { %12 = vsyncpa [#allocation4], 0  ;;  %s19_s20 = sshll.u32 %s299_s1, 4  ;;  %s245_s21 = smov [#allocation2]   ;;  %s20_s20 = int_to_ptr.hbm [resolvable:$true] %s19_s20 }
   0x3   :  { %s21_s22 = sshll.u32 %s245_s21, 4  ;;  %s34_s25 = sshll.u32 %s301_s3, 4  ;;  %s22_s22 = int_to_ptr.vmem [resolvable:$true] %s21_s22  ;;  %s35_s25 = int_to_ptr.hbm [resolvable:$true] %s34_s25 }
   0x4   :  { %s246_s26 = smov 128   ;;  %s247_s27 = smov 8  }
   0x5   :  { %27 = dma.hbm_to_vmem [thread:$0]  %s20_s20, 2048, %s22_s22, [#allocation3], %s246_s26, %s246_s26, %s247_s27  }
   0x6   :  { %s248_s28 = smov [#allocation5]  }
   0x7   :  { %s36_s29 = sshll.u32 %s248_s28, 4  ;;  %s37_s29 = int_to_ptr.vmem [resolvable:$true] %s36_s29 }
   0x8   :  { %42 = dma.hbm_to_vmem [thread:$0]  %s35_s25, 2048, %s37_s29, [#allocation6], %s246_s26, %s246_s26, %s247_s27  }
   0x9   :  { %239 = dma.done.wait [#allocation3], 2048  }
   0xa   :  { %240 = vsyncadd [#allocation3], 4294965248 }
   0xb   :  { %241 = dma.done.wait [#allocation6], 2048  }
   0xc   :  { %242 = vsyncadd [#allocation6], 4294965248  ;;  %v68_v0 = vld [vmem:[#allocation2 + $0x70] sm:$0xff]  ;;  %v69_v1 = vld [vmem:[#allocation2 + $0x78] sm:$0xff]  ;;  %s249_s8 = smov [#allocation7]   ;;  %s147_s12 = sshll.u32 %s303_s5, 4  ;;  %s148_s12 = int_to_ptr.hbm [resolvable:$true] %s147_s12 }
   0xd   :  { %v66_v2 = vld [vmem:[#allocation2 + $0x60] sm:$0xff]  ;;  %v78_v3 = vpack.c.bf16 %v69_v1, %v68_v0  ;;  %v67_v4 = vld [vmem:[#allocation2 + $0x68] sm:$0xff]  ;;  %v64_v6 = vld [vmem:[#allocation2 + $0x50] sm:$0xff]  ;;  %s145_s9 = sshll.u32 %s249_s8, 4  ;;  %s146_s9 = int_to_ptr.vmem [resolvable:$true] %s145_s9 }
   0xe   :  { %v77_v5 = vpack.c.bf16 %v67_v4, %v66_v2  ;;  %v65_v7 = vld [vmem:[#allocation2 + $0x58] sm:$0xff]  ;;  %v111_v8 = vld [vmem:[#allocation5 + $0x70] sm:$0xff]  ;;  %v109_v10 = vld [vmem:[#allocation5 + $0x60] sm:$0xff] }
   0xf   :  { %83 = vmatpush.bf16.msra.mxu0 %v78_v3  ;;  %v112_v9 = vld [vmem:[#allocation5 + $0x78] sm:$0xff]  ;;  %v110_v11 = vld [vmem:[#allocation5 + $0x68] sm:$0xff]  ;;  %v76_v12 = vpack.c.bf16 %v65_v7, %v64_v6  ;;  %v62_v14 = vld [vmem:[#allocation2 + $0x40] sm:$0xff] }
  0x10   :  { %v121_v13 = vpack.c.bf16 %v112_v9, %v111_v8  ;;  %v63_v15 = vld [vmem:[#allocation2 + $0x48] sm:$0xff]  ;;  %v120_v16 = vpack.c.bf16 %v110_v11, %v109_v10  ;;  %v107_v17 = vld [vmem:[#allocation5 + $0x50] sm:$0xff]  ;;  %v108_v18 = vld [vmem:[#allocation5 + $0x58] sm:$0xff] }
  0x11   :  { %v75_v19 = vpack.c.bf16 %v63_v15, %v62_v14  ;;  %v60_v20 = vld [vmem:[#allocation2 + $0x30] sm:$0xff]  ;;  %v61_v21 = vld [vmem:[#allocation2 + $0x38] sm:$0xff]  ;;  %v119_v22 = vpack.c.bf16 %v108_v18, %v107_v17  ;;  %v105_v23 = vld [vmem:[#allocation5 + $0x40] sm:$0xff] }
  0x12   :  { %126 = vmatpush.bf16.msra.mxu1 %v121_v13  ;;  %v106_v24 = vld [vmem:[#allocation5 + $0x48] sm:$0xff]  ;;  %v74_v25 = vpack.c.bf16 %v61_v21, %v60_v20  ;;  %v58_v26 = vld [vmem:[#allocation2 + $0x20] sm:$0xff]  ;;  %v103_v29 = vld [vmem:[#allocation5 + $0x30] sm:$0xff] }
  0x13   :  { %84 = vmatpush.bf16.msra.mxu0 %v77_v5  ;;  %v59_v27 = vld [vmem:[#allocation2 + $0x28] sm:$0xff]  ;;  %v118_v28 = vpack.c.bf16 %v106_v24, %v105_v23  ;;  %v104_v30 = vld [vmem:[#allocation5 + $0x38] sm:$0xff]  ;;  %v56_v32 = vld [vmem:[#allocation2 + $0x10] sm:$0xff] }
  0x14   :  { %v73_v31 = vpack.c.bf16 %v59_v27, %v58_v26  ;;  %v57_v33 = vld [vmem:[#allocation2 + $0x18] sm:$0xff]  ;;  %v117_v34 = vpack.c.bf16 %v104_v30, %v103_v29  ;;  %v54_v36 = vld [vmem:[#allocation2] sm:$0xff]  ;;  %v55_v37 = vld [vmem:[#allocation2 + $0x8] sm:$0xff] }
  0x15   :  { %v72_v35 = vpack.c.bf16 %v57_v33, %v56_v32  ;;  %v71_v38 = vpack.c.bf16 %v55_v37, %v54_v36  ;;  %v53_v39 = vld [vmem:[%s298_s0] sm:$0x3]  ;;  %v102_v42 = vld [vmem:[#allocation5 + $0x28] sm:$0xff]  ;;  %v99_v44 = vld [vmem:[#allocation5 + $0x10] sm:$0xff] }
  0x16   :  { %127 = vmatpush.bf16.msra.mxu1 %v120_v16  ;;  %v70_v40 = vpack.c.bf16 %v53_v39, %v53_v39  ;;  %v101_v41 = vld [vmem:[#allocation5 + $0x20] sm:$0xff]  ;;  %v100_v45 = vld [vmem:[#allocation5 + $0x18] sm:$0xff]  ;;  %v98_v48 = vld [vmem:[#allocation5 + $0x8] sm:$0xff] }
  0x17   :  { %85 = vmatpush.bf16.msra.mxu0 %v76_v12  ;;  %v116_v43 = vpack.c.bf16 %v102_v42, %v101_v41  ;;  %v115_v46 = vpack.c.bf16 %v100_v45, %v99_v44  ;;  %v97_v47 = vld [vmem:[#allocation5] sm:$0xff] }
  0x18   :  { %v114_v49 = vpack.c.bf16 %v98_v48, %v97_v47  ;;  %v163_v50 = vld [vmem:[%s300_s2] ss:$0 sm:$0xff] }
  0x19   :  { %v164_v56 = vld [vmem:[%s302_s4] ss:$0 sm:$0xff] }
  0x1a   :  { %128 = vmatpush.bf16.msra.mxu1 %v119_v22 }
  0x1b   :  { %86 = vmatpush.bf16.msra.mxu0 %v75_v19 }
  0x1e   :  { %129 = vmatpush.bf16.msra.mxu1 %v118_v28 }
  0x1f   :  { %87 = vmatpush.bf16.msra.mxu0 %v74_v25 }
  0x22   :  { %130 = vmatpush.bf16.msra.mxu1 %v117_v34 }
  0x23   :  { %88 = vmatpush.bf16.msra.mxu0 %v73_v31 }
  0x26   :  { %131 = vmatpush.bf16.msra.mxu1 %v116_v43 }
  0x27   :  { %89 = vmatpush.bf16.msra.mxu0 %v72_v35 }
  0x2a   :  { %132 = vmatpush.bf16.msra.mxu1 %v115_v46 }
  0x2b   :  { %90 = vmatpush.bf16.msra.mxu0 %v71_v38 }
  0x2e   :  { %91 = vmatmul.bf16.vlgmr.msra.gmra.mxu0 %v70_v40  ;;  %133 = vmatpush.bf16.msra.mxu1 %v114_v49 }
  0xab   :  { %v92_v51 = vpop.f32.mrf.mxu0 }
  0xac   :  { %v93_v52 = vadd.f32 %v163_v50, %v92_v51 }
  0xae   :  { %165 = vtanh.f32 %v93_v52 }
  0xb3   :  { %v94_v53 = vpop.f32.mrf.mxu0 }
  0xb4   :  { %v166_v54 = vpop.eup %165 }
  0xb5   :  { %v113_v55 = vpack.c.bf16 %v166_v54, %v166_v54 }
  0xb7   :  { %134 = vmatmul.bf16.vlgmr.msra.gmra.mxu1 %v113_v55 }
 0x134   :  { %v135_v57 = vpop.f32.mrf.mxu1 }
 0x135   :  { %v136_v58 = vadd.f32 %v164_v56, %v135_v57 }
 0x137   :  { %139 = vst [vmem:[#allocation7] sm:$0x3] %v136_v58 }
 0x138   :  { %150 = dma.vmem_to_hbm [thread:$0]  %s146_s9, 32, %s148_s12, [#allocation4]  }
 0x13c   :  { %v137_v59 = vpop.f32.mrf.mxu1 }
 0x13d   :  { %243 = dma.done.wait [#allocation4], 32  }
 0x13e   :  { %244 = vsyncadd [#allocation4], 4294967264 }
 0x13f   :  { %155 = vsyncpa [#allocation3], 1 }
 0x140   :  { %156 = vsyncpa [#allocation6], 1 }
 0x141   :  { %157 = vsyncpa [#allocation4], 1 }

// kernel: bert_forward.8
= control target key start
LH: loop header
LB: loop body
LE: loop exit
PB: predicated region body
PF: predicated region fallthrough
CT: control target
= control target key end

     0   :  { %12 = vsyncpa [#allocation3], 0  ;;  %s1401_s0 = inlined_call_operand.vmem [shape: f32[16,128], index: 0, kind: input, shape index: {}]   ;;  %s1402_s1 = inlined_call_operand.hbm [shape: f32[128,512], index: 1, kind: input, shape index: {}]   ;;  %s1403_s2 = inlined_call_operand.vmem [shape: f32[1,512], index: 2, kind: input, shape index: {}]   ;;  %s1404_s3 = inlined_call_operand.hbm [shape: f32[512,128], index: 3, kind: input, shape index: {}]   ;;  %s1405_s4 = inlined_call_operand.vmem [shape: f32[1,128], index: 4, kind: input, shape index: {}]   ;;  %s1406_s5 = inlined_call_operand.vmem [shape: f32[1,128], index: 5, kind: input, shape index: {}]   ;;  %s1407_s6 = inlined_call_operand.vmem [shape: f32[1,128], index: 6, kind: input, shape index: {}]   ;;  %s1408_s7 = inlined_call_operand.vmem [shape: f32[16,128], index: 7, kind: output, shape index: {}]  }
   0x1   :  { %s20_s26 = sshll.u32 %s1402_s1, 4  ;;  %s21_s26 = int_to_ptr.hbm [resolvable:$true] %s20_s26 }
   0x2   :  { %13 = vsyncpa [#allocation5], 0  ;;  %s898_s27 = smov [#allocation2]   ;;  %s35_s8 = sshll.u32 %s1404_s3, 4  ;;  %s36_s8 = int_to_ptr.hbm [resolvable:$true] %s35_s8 }
   0x3   :  { %s22_s28 = sshll.u32 %s898_s27, 4  ;;  %s899_s9 = smov 512   ;;  %s23_s28 = int_to_ptr.vmem [resolvable:$true] %s22_s28 }
   0x4   :  { %s900_s10 = smov 32   ;;  %s901_s11 = smov [#allocation4]  }
   0x5   :  { %28 = dma.hbm_to_vmem [thread:$0]  %s21_s26, 8192, %s23_s28, [#allocation3], %s899_s9, %s899_s9, %s900_s10  }
   0x6   :  { %s37_s12 = sshll.u32 %s901_s11, 4  ;;  %s902_s13 = smov 128   ;;  %s38_s12 = int_to_ptr.vmem [resolvable:$true] %s37_s12 }
   0x7   :  { %s903_s14 = smov 8  }
   0x8   :  { %43 = dma.hbm_to_vmem [thread:$0]  %s36_s8, 8192, %s38_s12, [#allocation5], %s902_s13, %s902_s13, %s903_s14  }
   0x9   :  { %894 = dma.done.wait [#allocation3], 8192  }
   0xa   :  { %895 = vsyncadd [#allocation3], 4294959104 }
   0xb   :  { %896 = dma.done.wait [#allocation5], 8192  }
   0xc   :  { %897 = vsyncadd [#allocation5], 4294959104  ;;  %v116_v0 = vld [vmem:[#allocation2 + $0x1c0] sm:$0xff]  ;;  %v117_v2 = vld [vmem:[#allocation2 + $0x1c8] sm:$0xff] }
   0xd   :  { %v120_v1 = vld [vmem:[#allocation2 + $0x1e0] sm:$0xff]  ;;  %v121_v4 = vld [vmem:[#allocation2 + $0x1e8] sm:$0xff]  ;;  %v118_v5 = vld [vmem:[#allocation2 + $0x1d0] sm:$0xff] }
   0xe   :  { %v153_v3 = vpack.c.bf16 %v120_v1, %v116_v0  ;;  %v122_v6 = vld [vmem:[#allocation2 + $0x1f0] sm:$0xff]  ;;  %v154_v7 = vpack.c.bf16 %v121_v4, %v117_v2  ;;  %v119_v9 = vld [vmem:[#allocation2 + $0x1d8] sm:$0xff]  ;;  %v108_v11 = vld [vmem:[#allocation2 + $0x180] sm:$0xff] }
   0xf   :  { %v155_v8 = vpack.c.bf16 %v122_v6, %v118_v5  ;;  %v123_v10 = vld [vmem:[#allocation2 + $0x1f8] sm:$0xff]  ;;  %v112_v13 = vld [vmem:[#allocation2 + $0x1a0] sm:$0xff]  ;;  %v109_v14 = vld [vmem:[#allocation2 + $0x188] sm:$0xff] }
  0x10   :  { %167 = vmatpush.bf16.msra.mxu0 %v153_v3  ;;  %v156_v12 = vpack.c.bf16 %v123_v10, %v119_v9  ;;  %v113_v15 = vld [vmem:[#allocation2 + $0x1a8] sm:$0xff]  ;;  %181 = vmatpush.bf16.msra.mxu1 %v154_v7  ;;  %v149_v16 = vpack.c.bf16 %v112_v13, %v108_v11  ;;  %v110_v18 = vld [vmem:[#allocation2 + $0x190] sm:$0xff]  ;;  %v111_v20 = vld [vmem:[#allocation2 + $0x198] sm:$0xff] }
  0x11   :  { %195 = vmatpush.bf16.msra.mxu2 %v155_v8  ;;  %v150_v17 = vpack.c.bf16 %v113_v15, %v109_v14  ;;  %v114_v19 = vld [vmem:[#allocation2 + $0x1b0] sm:$0xff]  ;;  %v115_v22 = vld [vmem:[#allocation2 + $0x1b8] sm:$0xff]  ;;  %v100_v23 = vld [vmem:[#allocation2 + $0x140] sm:$0xff] }
  0x12   :  { %209 = vmatpush.bf16.msra.mxu3 %v156_v12  ;;  %v151_v21 = vpack.c.bf16 %v114_v19, %v110_v18  ;;  %v104_v24 = vld [vmem:[#allocation2 + $0x160] sm:$0xff]  ;;  %v152_v25 = vpack.c.bf16 %v115_v22, %v111_v20  ;;  %v101_v26 = vld [vmem:[#allocation2 + $0x148] sm:$0xff]  ;;  %v102_v28 = vld [vmem:[#allocation2 + $0x150] sm:$0xff] }
  0x13   :  { %v105_v27 = vld [vmem:[#allocation2 + $0x168] sm:$0xff]  ;;  %v145_v29 = vpack.c.bf16 %v104_v24, %v100_v23  ;;  %v106_v30 = vld [vmem:[#allocation2 + $0x170] sm:$0xff]  ;;  %v103_v31 = vld [vmem:[#allocation2 + $0x158] sm:$0xff] }
  0x14   :  { %168 = vmatpush.bf16.msra.mxu0 %v149_v16  ;;  %v107_v32 = vld [vmem:[#allocation2 + $0x178] sm:$0xff]  ;;  %182 = vmatpush.bf16.msra.mxu1 %v150_v17  ;;  %v146_v33 = vpack.c.bf16 %v105_v27, %v101_v26  ;;  %v147_v34 = vpack.c.bf16 %v106_v30, %v102_v28  ;;  %v92_v35 = vld [vmem:[#allocation2 + $0x100] sm:$0xff]  ;;  %v93_v37 = vld [vmem:[#allocation2 + $0x108] sm:$0xff] }
  0x15   :  { %196 = vmatpush.bf16.msra.mxu2 %v151_v21  ;;  %v96_v36 = vld [vmem:[#allocation2 + $0x120] sm:$0xff]  ;;  %v148_v38 = vpack.c.bf16 %v107_v32, %v103_v31  ;;  %v97_v39 = vld [vmem:[#allocation2 + $0x128] sm:$0xff]  ;;  %v94_v40 = vld [vmem:[#allocation2 + $0x110] sm:$0xff] }
  0x16   :  { %210 = vmatpush.bf16.msra.mxu3 %v152_v25  ;;  %v98_v41 = vld [vmem:[#allocation2 + $0x130] sm:$0xff]  ;;  %v95_v42 = vld [vmem:[#allocation2 + $0x118] sm:$0xff]  ;;  %v141_v44 = vpack.c.bf16 %v96_v36, %v92_v35  ;;  %v142_v45 = vpack.c.bf16 %v97_v39, %v93_v37  ;;  %v84_v47 = vld [vmem:[#allocation2 + $0xc0] sm:$0xff] }
  0x17   :  { %v99_v43 = vld [vmem:[#allocation2 + $0x138] sm:$0xff]  ;;  %v143_v46 = vpack.c.bf16 %v98_v41, %v94_v40  ;;  %v88_v48 = vld [vmem:[#allocation2 + $0xe0] sm:$0xff]  ;;  %v85_v49 = vld [vmem:[#allocation2 + $0xc8] sm:$0xff] }
  0x18   :  { %169 = vmatpush.bf16.msra.mxu0 %v145_v29  ;;  %183 = vmatpush.bf16.msra.mxu1 %v146_v33  ;;  %v144_v50 = vpack.c.bf16 %v99_v43, %v95_v42  ;;  %v89_v51 = vld [vmem:[#allocation2 + $0xe8] sm:$0xff]  ;;  %v86_v52 = vld [vmem:[#allocation2 + $0xd0] sm:$0xff]  ;;  %v87_v54 = vld [vmem:[#allocation2 + $0xd8] sm:$0xff]  ;;  %v137_v56 = vpack.c.bf16 %v88_v48, %v84_v47 }
  0x19   :  { %197 = vmatpush.bf16.msra.mxu2 %v147_v34  ;;  %v90_v53 = vld [vmem:[#allocation2 + $0xf0] sm:$0xff]  ;;  %v91_v55 = vld [vmem:[#allocation2 + $0xf8] sm:$0xff]  ;;  %v138_v57 = vpack.c.bf16 %v89_v51, %v85_v49  ;;  %v76_v59 = vld [vmem:[#allocation2 + $0x80] sm:$0xff] }
  0x1a   :  { %211 = vmatpush.bf16.msra.mxu3 %v148_v38  ;;  %v139_v58 = vpack.c.bf16 %v90_v53, %v86_v52  ;;  %v80_v60 = vld [vmem:[#allocation2 + $0xa0] sm:$0xff]  ;;  %v77_v61 = vld [vmem:[#allocation2 + $0x88] sm:$0xff]  ;;  %v140_v62 = vpack.c.bf16 %v91_v55, %v87_v54  ;;  %v78_v0 = vld [vmem:[#allocation2 + $0x90] sm:$0xff] }
  0x1b   :  { %v81_v63 = vld [vmem:[#allocation2 + $0xa8] sm:$0xff]  ;;  %v82_v1 = vld [vmem:[#allocation2 + $0xb0] sm:$0xff]  ;;  %v79_v2 = vld [vmem:[#allocation2 + $0x98] sm:$0xff]  ;;  %v133_v4 = vpack.c.bf16 %v80_v60, %v76_v59 }
  0x1c   :  { %170 = vmatpush.bf16.msra.mxu0 %v141_v44  ;;  %184 = vmatpush.bf16.msra.mxu1 %v142_v45  ;;  %v83_v3 = vld [vmem:[#allocation2 + $0xb8] sm:$0xff]  ;;  %v68_v5 = vld [vmem:[#allocation2 + $0x40] sm:$0xff]  ;;  %v134_v6 = vpack.c.bf16 %v81_v63, %v77_v61  ;;  %v135_v7 = vpack.c.bf16 %v82_v1, %v78_v0  ;;  %v69_v9 = vld [vmem:[#allocation2 + $0x48] sm:$0xff] }
  0x1d   :  { %198 = vmatpush.bf16.msra.mxu2 %v143_v46  ;;  %v72_v8 = vld [vmem:[#allocation2 + $0x60] sm:$0xff]  ;;  %v73_v10 = vld [vmem:[#allocation2 + $0x68] sm:$0xff]  ;;  %v136_v11 = vpack.c.bf16 %v83_v3, %v79_v2  ;;  %v70_v12 = vld [vmem:[#allocation2 + $0x50] sm:$0xff] }
  0x1e   :  { %212 = vmatpush.bf16.msra.mxu3 %v144_v50  ;;  %v74_v13 = vld [vmem:[#allocation2 + $0x70] sm:$0xff]  ;;  %v71_v14 = vld [vmem:[#allocation2 + $0x58] sm:$0xff]  ;;  %v129_v16 = vpack.c.bf16 %v72_v8, %v68_v5  ;;  %v130_v17 = vpack.c.bf16 %v73_v10, %v69_v9  ;;  %v60_v19 = vld [vmem:[#allocation2] sm:$0xff] }
  0x1f   :  { %v75_v15 = vld [vmem:[#allocation2 + $0x78] sm:$0xff]  ;;  %v131_v18 = vpack.c.bf16 %v74_v13, %v70_v12  ;;  %v64_v20 = vld [vmem:[#allocation2 + $0x20] sm:$0xff]  ;;  %v61_v21 = vld [vmem:[#allocation2 + $0x8] sm:$0xff] }
  0x20   :  { %171 = vmatpush.bf16.msra.mxu0 %v137_v56  ;;  %185 = vmatpush.bf16.msra.mxu1 %v138_v57  ;;  %v132_v22 = vpack.c.bf16 %v75_v15, %v71_v14  ;;  %v65_v23 = vld [vmem:[#allocation2 + $0x28] sm:$0xff]  ;;  %v62_v24 = vld [vmem:[#allocation2 + $0x10] sm:$0xff]  ;;  %v63_v26 = vld [vmem:[#allocation2 + $0x18] sm:$0xff]  ;;  %v125_v28 = vpack.c.bf16 %v64_v20, %v60_v19 }
  0x21   :  { %199 = vmatpush.bf16.msra.mxu2 %v139_v58  ;;  %v66_v25 = vld [vmem:[#allocation2 + $0x30] sm:$0xff]  ;;  %v67_v27 = vld [vmem:[#allocation2 + $0x38] sm:$0xff]  ;;  %v58_v29 = vld [vmem:[%s1401_s0] sm:$0xff]  ;;  %v126_v31 = vpack.c.bf16 %v65_v23, %v61_v21 }
  0x22   :  { %213 = vmatpush.bf16.msra.mxu3 %v140_v62  ;;  %v59_v30 = vld [vmem:[%s1401_s0 + $0x8] sm:$0xff]  ;;  %v127_v32 = vpack.c.bf16 %v66_v25, %v62_v24  ;;  %v128_v33 = vpack.c.bf16 %v67_v27, %v63_v26  ;;  %v960_v35 = vld [vmem:[%s1403_s2] sm:$0xf] }
  0x23   :  { %v124_v34 = vpack.c.bf16 %v59_v30, %v58_v29  ;;  %v159_v36 = vperm.slane %v960_v35, 0  ;;  %v160_v37 = vperm.slane %v960_v35, 1  ;;  %v161_v44 = vperm.slane %v960_v35, 2 }
  0x24   :  { %172 = vmatpush.bf16.msra.mxu0 %v133_v4  ;;  %186 = vmatpush.bf16.msra.mxu1 %v134_v6  ;;  %v162_v46 = vperm.slane %v960_v35, 3 }
  0x25   :  { %200 = vmatpush.bf16.msra.mxu2 %v135_v7 }
  0x26   :  { %214 = vmatpush.bf16.msra.mxu3 %v136_v11 }
  0x28   :  { %173 = vmatpush.bf16.msra.mxu0 %v129_v16  ;;  %187 = vmatpush.bf16.msra.mxu1 %v130_v17 }
  0x29   :  { %201 = vmatpush.bf16.msra.mxu2 %v131_v18 }
  0x2a   :  { %215 = vmatpush.bf16.msra.mxu3 %v132_v22 }
  0x2c   :  { %174 = vmatpush.bf16.msra.mxu0 %v125_v28  ;;  %188 = vmatpush.bf16.msra.mxu1 %v126_v31 }
  0x2d   :  { %202 = vmatpush.bf16.msra.mxu2 %v127_v32 }
  0x2e   :  { %216 = vmatpush.bf16.msra.mxu3 %v128_v33 }
  0x2f   :  { %175 = vmatmul.bf16.vlgmr.msra.gmra.mxu0 %v124_v34  ;;  %189 = vmatmul.bf16.vlgmr.msra.gmra.mxu1 %v124_v34 }
  0x30   :  { %203 = vmatmul.bf16.vlgmr.msra.gmra.mxu2 %v124_v34 }
  0x31   :  { %217 = vmatmul.bf16.vlgmr.msra.gmra.mxu3 %v124_v34 }
  0xac   :  { %v176_v38 = vpop.f32.mrf.mxu0  ;;  %v190_v40 = vpop.f32.mrf.mxu1 }
  0xad   :  { %v964_v39 = vadd.f32 %v176_v38, %v159_v36  ;;  %v968_v41 = vadd.f32 %v190_v40, %v160_v37 }
  0xaf   :  { %v971_v42 = vmul.f32 0.70710677, %v964_v39  ;;  %v974_v43 = vmul.f32 0.70710677, %v968_v41 }
  0xb1   :  { %v239_v45 = vmul.f32 %v971_v42, %v971_v42  ;;  %v279_v47 = vmul.f32 %v974_v43, %v974_v43 }
  0xb3   :  { %v982_v48 = vmin.f32 %v239_v45, 16.0  ;;  %v204_v49 = vpop.f32.mrf.mxu2  ;;  %v984_v50 = vmin.f32 %v279_v47, 16.0 }
  0xb4   :  { %v988_v51 = vadd.f32 %v204_v49, %v161_v44  ;;  %v218_v52 = vpop.f32.mrf.mxu3  ;;  %v178_v4 = vpop.f32.mrf.mxu0 }
  0xb5   :  { %v241_v53 = vmul.f32 2.1237322e-06, %v982_v48  ;;  %v252_v54 = vmul.f32 3.8918573e-05, %v982_v48  ;;  %v994_v55 = vadd.f32 %v218_v52, %v162_v46  ;;  %v281_v56 = vmul.f32 2.1237322e-06, %v984_v50  ;;  %v192_v52 = vpop.f32.mrf.mxu1 }
  0xb6   :  { %v292_v57 = vmul.f32 3.8918573e-05, %v984_v50  ;;  %v999_v60 = vmul.f32 0.70710677, %v988_v51  ;;  %v1016_v12 = vadd.f32 %v178_v4, %v159_v36 }
  0xb7   :  { %v242_v58 = vadd.f32 0.00028619796, %v241_v53  ;;  %v253_v59 = vadd.f32 0.001143296, %v252_v54  ;;  %v282_v61 = vadd.f32 0.00028619796, %v281_v56 }
  0xb8   :  { %v293_v62 = vadd.f32 0.001143296, %v292_v57  ;;  %v319_v0 = vmul.f32 %v999_v60, %v999_v60  ;;  %v1005_v1 = vmul.f32 0.70710677, %v994_v55  ;;  %v1024_v22 = vmul.f32 0.70710677, %v1016_v12 }
  0xb9   :  { %v254_v63 = vmul.f32 %v253_v59, %v982_v48  ;;  %v243_v2 = vmul.f32 %v242_v58, %v982_v48  ;;  %v283_v8 = vmul.f32 %v282_v61, %v984_v50 }
  0xba   :  { %v294_v3 = vmul.f32 %v293_v62, %v984_v50  ;;  %v1009_v6 = vmin.f32 %v319_v0, 16.0  ;;  %v359_v7 = vmul.f32 %v1005_v1, %v1005_v1  ;;  %v399_v34 = vmul.f32 %v1024_v22, %v1024_v22 }
  0xbb   :  { %v255_v5 = vadd.f32 0.014752088, %v254_v63  ;;  %v244_v13 = vadd.f32 0.0036580483, %v243_v2  ;;  %v284_v17 = vadd.f32 0.0036580483, %v283_v8  ;;  %v193_v62 = vadd.f32 %v192_v52, %v160_v37 }
  0xbc   :  { %v295_v9 = vadd.f32 0.014752088, %v294_v3  ;;  %v332_v11 = vmul.f32 3.8918573e-05, %v1009_v6  ;;  %v1019_v15 = vmin.f32 %v359_v7, 16.0  ;;  %v1044_v59 = vmin.f32 %v399_v34, 16.0 }
  0xbd   :  { %v256_v10 = vmul.f32 %v255_v5, %v982_v48  ;;  %v321_v21 = vmul.f32 2.1237322e-06, %v1009_v6  ;;  %v245_v23 = vmul.f32 %v244_v13, %v982_v48  ;;  %v285_v29 = vmul.f32 %v284_v17, %v984_v50 }
  0xbe   :  { %v296_v14 = vmul.f32 %v295_v9, %v984_v50  ;;  %v333_v19 = vadd.f32 0.001143296, %v332_v11  ;;  %v372_v26 = vmul.f32 3.8918573e-05, %v1019_v15  ;;  %v361_v28 = vmul.f32 2.1237322e-06, %v1019_v15 }
  0xbf   :  { %v257_v16 = vadd.f32 0.112945676, %v256_v10  ;;  %v322_v33 = vadd.f32 0.00028619796, %v321_v21  ;;  %v246_v36 = vadd.f32 0.05243302, %v245_v23 }
  0xc0   :  { %v297_v18 = vadd.f32 0.112945676, %v296_v14  ;;  %v334_v25 = vmul.f32 %v333_v19, %v1009_v6  ;;  %v373_v45 = vadd.f32 0.001143296, %v372_v26  ;;  %v362_v49 = vadd.f32 0.00028619796, %v361_v28  ;;  %v220_v28 = vpop.f32.mrf.mxu3 }
  0xc1   :  { %v258_v20 = vmul.f32 %v257_v16, %v982_v48  ;;  %v286_v53 = vadd.f32 0.05243302, %v285_v29  ;;  %v323_v58 = vmul.f32 %v322_v33, %v1009_v6  ;;  %v247_v61 = vmul.f32 %v246_v36, %v982_v48 }
  0xc2   :  { %v298_v24 = vmul.f32 %v297_v18, %v984_v50  ;;  %v335_v31 = vadd.f32 0.014752088, %v334_v25  ;;  %v374_v57 = vmul.f32 %v373_v45, %v1019_v15  ;;  %v363_v63 = vmul.f32 %v362_v49, %v1019_v15 }
  0xc3   :  { %v259_v27 = vadd.f32 0.4994258, %v258_v20  ;;  %v287_v0 = vmul.f32 %v286_v53, %v984_v50  ;;  %v324_v4 = vadd.f32 0.0036580483, %v323_v58  ;;  %v401_v5 = vmul.f32 2.1237322e-06, %v1044_v59 }
  0xc4   :  { %v299_v30 = vadd.f32 0.4994258, %v298_v24  ;;  %v336_v40 = vmul.f32 %v335_v31, %v1009_v6  ;;  %v375_v3 = vadd.f32 0.014752088, %v374_v57  ;;  %v248_v7 = vadd.f32 0.18741608, %v247_v61 }
  0xc5   :  { %v260_v32 = vmul.f32 %v259_v27, %v982_v48  ;;  %v1054_v9 = vmul.f32 0.70710677, %v193_v62  ;;  %v364_v11 = vadd.f32 0.0036580483, %v363_v63  ;;  %v402_v37 = vadd.f32 0.00028619796, %v401_v5  ;;  %v206_v27 = vpop.f32.mrf.mxu2 }
  0xc6   :  { %v300_v38 = vmul.f32 %v299_v30, %v984_v50  ;;  %v337_v56 = vadd.f32 0.112945676, %v336_v40  ;;  %v376_v13 = vmul.f32 %v375_v3, %v1019_v15  ;;  %v412_v14 = vmul.f32 3.8918573e-05, %v1044_v59 }
  0xc7   :  { %v1037_v47 = vadd.f32 1.0, %v260_v32  ;;  %v288_v18 = vadd.f32 0.18741608, %v287_v0  ;;  %v1065_v19 = vmul.f32 0.5, %v964_v39  ;;  %v325_v21 = vmul.f32 %v324_v4, %v1009_v6 }
  0xc8   :  { %v1039_v54 = vadd.f32 1.0, %v300_v38  ;;  %v338_v2 = vmul.f32 %v337_v56, %v1009_v6  ;;  %v249_v23 = vmul.f32 %v248_v7, %v982_v48  ;;  %v439_v26 = vmul.f32 %v1054_v9, %v1054_v9 }
  0xc9   :  { %822 = vrcp.f32 %v1037_v47  ;;  %v365_v29 = vmul.f32 %v364_v11, %v1019_v15  ;;  %v377_v30 = vadd.f32 0.112945676, %v376_v13  ;;  %v403_v39 = vmul.f32 %v402_v37, %v1044_v59 }
  0xca   :  { %824 = vrcp.f32 %v1039_v54  ;;  %v339_v8 = vadd.f32 0.4994258, %v338_v2  ;;  %v413_v31 = vadd.f32 0.001143296, %v412_v14  ;;  %v1077_v32 = vmul.f32 0.5, %v968_v41 }
  0xcb   :  { %v289_v33 = vmul.f32 %v288_v18, %v984_v50  ;;  %v1081_v34 = vmul.f32 0.5, %v1016_v12  ;;  %v326_v36 = vadd.f32 0.05243302, %v325_v21  ;;  %v1083_v38 = vmul.f32 0.5, %v193_v62 }
  0xcc   :  { %v340_v25 = vmul.f32 %v339_v8, %v1009_v6  ;;  %v1087_v40 = vadd.f32 %v206_v27, %v161_v44  ;;  %v1091_v45 = vadd.f32 %v220_v28, %v162_v46  ;;  %v414_v50 = vmul.f32 %v413_v31, %v1044_v59  ;;  %v589_v27 = vld [vmem:[#allocation4 + $0x70] sm:$0xff]  ;;  %v590_v28 = vld [vmem:[#allocation4 + $0x78] sm:$0xff] }
  0xcd   :  { %v1097_v52 = vmin.f32 %v439_v26, 16.0  ;;  %v250_v12 = vadd.f32 1.1283791, %v249_v23  ;;  %v366_v53 = vadd.f32 0.05243302, %v365_v29  ;;  %v378_v56 = vmul.f32 %v377_v30, %v1019_v15 }
  0xce   :  { %v1094_v49 = vadd.f32 1.0, %v340_v25  ;;  %v404_v57 = vadd.f32 0.0036580483, %v403_v39  ;;  %v271_v44 = vand.u32 2147483647, %v1037_v47  ;;  %v273_v61 = vand.u32 2147483648, %v1037_v47 }
  0xcf   :  { %v1056_v10 = vpop.eup %822  ;;  %v290_v58 = vadd.f32 1.1283791, %v289_v33  ;;  %v415_v46 = vadd.f32 0.014752088, %v414_v50  ;;  %v311_v62 = vand.u32 2147483647, %v1039_v54  ;;  %v327_v63 = vmul.f32 %v326_v36, %v1009_v6 }
  0xd0   :  { %v1060_v16 = vpop.eup %824  ;;  %v263_v17 = vmul.f32 %v1056_v10, %v1037_v47  ;;  %vm268_vm0 = vweird.f32 %v1056_v10  ;;  %826 = vrcp.f32 %v1094_v49  ;;  %v441_v3 = vmul.f32 2.1237322e-06, %v1097_v52 }
  0xd1   :  { %v303_v20 = vmul.f32 %v1060_v16, %v1039_v54  ;;  %v416_v2 = vmul.f32 %v415_v46, %v1044_v59  ;;  %v251_v4 = vmul.f32 %v250_v12, %v971_v42  ;;  %v367_v5 = vmul.f32 %v366_v53, %v1019_v15 }
  0xd2   :  { %v264_v24 = vsub.f32 1.0, %v263_v17  ;;  %v379_v7 = vadd.f32 0.4994258, %v378_v56  ;;  %v405_v8 = vmul.f32 %v404_v57, %v1044_v59  ;;  %vm267_vm1 = vweird.f32 %v1037_v47 }
  0xd3   :  { %v304_v48 = vsub.f32 1.0, %v303_v20  ;;  %vm307_vm2 = vweird.f32 %v1039_v54  ;;  %vm308_vm3 = vweird.f32 %v1060_v16  ;;  %vm1119_vm4 = vmor %vm267_vm1, %vm268_vm0  ;;  %vm1123_vm5 = vcmp.eq.f32.partialorder %v271_v44, 8.507059e+37 }
  0xd4   :  { %v265_v41 = vmul.f32 %v1056_v10, %v264_v24  ;;  %v274_v37 = vor.u32 1.1754944e-38, %v273_v61  ;;  %v313_v14 = vand.u32 2147483648, %v1039_v54  ;;  %v328_v47 = vadd.f32 0.18741608, %v327_v63  ;;  %vm1136_vm7 = vmor %vm307_vm2, %vm308_vm3  ;;  %v606_v24 = vld [vmem:[#allocation4 + $0xf8] sm:$0xff] }
  0xd5   :  { %v305_v35 = vmul.f32 %v1060_v16, %v304_v48  ;;  %vm1131_vm6 = vcmp.eq.f32.partialorder %v311_v62, 8.507059e+37  ;;  %v417_v20 = vadd.f32 0.112945676, %v416_v2  ;;  %v442_v21 = vadd.f32 0.00028619796, %v441_v3 }
  0xd6   :  { %v266_v0 = vadd.f32 %v1056_v10, %v265_v41  ;;  %v291_v23 = vmul.f32 %v290_v58, %v974_v43  ;;  %v368_v25 = vadd.f32 0.18741608, %v367_v5  ;;  %v380_v54 = vmul.f32 %v379_v7, %v1019_v15  ;;  %v1141_v29 = vpop.eup %826 }
  0xd7   :  { %v306_v11 = vadd.f32 %v1060_v16, %v305_v35  ;;  %v406_v26 = vadd.f32 0.05243302, %v405_v8  ;;  %v418_v30 = vmul.f32 %v417_v20, %v1044_v59  ;;  %v443_v43 = vmul.f32 %v442_v21, %v1097_v52 }
  0xd8   :  { %v270_v17 = vsel %vm1119_vm4, %v1056_v10, %v266_v0  ;;  %v452_v39 = vmul.f32 3.8918573e-05, %v1097_v52  ;;  %v314_v33 = vor.u32 1.1754944e-38, %v313_v14  ;;  %v329_v48 = vmul.f32 %v328_v47, %v1009_v6 }
  0xd9   :  { %v310_v10 = vsel %vm1136_vm7, %v1060_v16, %v306_v11  ;;  %v275_v31 = vsel %vm1123_vm5, %v274_v37, %v270_v17  ;;  %v1153_v36 = vmul.f32 0.70710677, %v1087_v40  ;;  %v419_v41 = vadd.f32 0.4994258, %v418_v30 }
  0xda   :  { %v444_v50 = vadd.f32 0.0036580483, %v443_v43  ;;  %v453_v12 = vadd.f32 0.001143296, %v452_v39  ;;  %v650_v53 = vpack.c.bf16 %v590_v28, %v589_v27  ;;  %v315_v16 = vsel %vm1131_vm6, %v314_v33, %v310_v10  ;;  %v587_v28 = vld [vmem:[#allocation4 + $0x60] sm:$0xff]  ;;  %v588_v10 = vld [vmem:[#allocation4 + $0x68] sm:$0xff] }
  0xdb   :  { %v343_v56 = vmul.f32 %v1141_v29, %v1094_v49  ;;  %v1159_v57 = vadd.f32 1.0, %v380_v54  ;;  %v407_v44 = vmul.f32 %v406_v26, %v1044_v59  ;;  %v353_v58 = vand.u32 2147483648, %v1094_v49 }
  0xdc   :  { %v369_v6 = vmul.f32 %v368_v25, %v1019_v15  ;;  %v420_v35 = vmul.f32 %v419_v41, %v1044_v59  ;;  %v454_v46 = vmul.f32 %v453_v12, %v1097_v52  ;;  %679 = vmatpush.bf16.msrb.mxu0 %v650_v53  ;;  %v276_v61 = vmul.f32 %v275_v31, %v251_v4  ;;  %v604_v12 = vld [vmem:[#allocation4 + $0xe8] sm:$0xff] }
  0xdd   :  { %v330_v62 = vadd.f32 1.1283791, %v329_v48  ;;  %v445_v63 = vmul.f32 %v444_v50, %v1097_v52  ;;  %v479_v0 = vmul.f32 %v1153_v36, %v1153_v36  ;;  %v316_v2 = vmul.f32 %v315_v16, %v291_v23  ;;  %v605_v23 = vld [vmem:[#allocation4 + $0xf0] sm:$0xff]  ;;  %v603_v50 = vld [vmem:[#allocation4 + $0xe0] sm:$0xff] }
  0xde   :  { %v351_v3 = vand.u32 2147483647, %v1094_v49  ;;  %v1170_v5 = vadd.f32 1.0, %v420_v35  ;;  %v455_v7 = vadd.f32 0.014752088, %v454_v46  ;;  %v344_v8 = vsub.f32 1.0, %v343_v56 }
  0xdf   :  { %828 = vrcp.f32 %v1159_v57  ;;  %v408_v15 = vadd.f32 0.18741608, %v407_v44  ;;  %v1173_v11 = vmin.f32 %v479_v0, 16.0  ;;  %v1175_v13 = vor.u32 1.1754944e-38, %v353_v58  ;;  %v637_v0 = vld [vmem:[#allocation4 + $0x1f0] sm:$0xff] }
  0xe0   :  { %v1177_v4 = vadd.f32 1.1283791, %v369_v6  ;;  %830 = vrcp.f32 %v1170_v5  ;;  %v1181_v42 = vmul.f32 0.70710677, %v1091_v45  ;;  %v804_v37 = vclamps-f32 %v276_v61, 1.0 }
  0xe1   :  { %v391_v14 = vand.u32 2147483647, %v1159_v57  ;;  %v446_v47 = vadd.f32 0.05243302, %v445_v63  ;;  %v456_v17 = vmul.f32 %v455_v7, %v1097_v52  ;;  %v1186_v18 = vmul.f32 %v330_v62, %v999_v60  ;;  %v621_v62 = vld [vmem:[#allocation4 + $0x170] sm:$0xff]  ;;  %v622_v63 = vld [vmem:[#allocation4 + $0x178] sm:$0xff] }
  0xe2   :  { %vm348_vm8 = vweird.f32 %v1141_v29  ;;  %v481_v20 = vmul.f32 2.1237322e-06, %v1173_v11  ;;  %v492_v21 = vmul.f32 3.8918573e-05, %v1173_v11  ;;  %v805_v25 = vclamps-f32 %v316_v2, 1.0 }
  0xe3   :  { %v345_v54 = vmul.f32 %v1141_v29, %v344_v8  ;;  %v409_v26 = vmul.f32 %v408_v15, %v1044_v59  ;;  %v457_v27 = vadd.f32 0.112945676, %v456_v17  ;;  %vm347_vm9 = vweird.f32 %v1094_v49  ;;  %v602_v49 = vld [vmem:[#allocation4 + $0xd8] sm:$0xff] }
  0xe4   :  { %v393_v60 = vand.u32 2147483648, %v1159_v57  ;;  %v482_v30 = vadd.f32 0.00028619796, %v481_v20  ;;  %v493_v43 = vadd.f32 0.001143296, %v492_v21  ;;  %v519_v39 = vmul.f32 %v1181_v42, %v1181_v42  ;;  %v638_v21 = vld [vmem:[#allocation4 + $0x1f8] sm:$0xff]  ;;  %vm1238_vm12 = vmor %vm347_vm9, %vm348_vm8 }
  0xe5   :  { %v1197_v31 = vpop.eup %828  ;;  %v559_v33 = vadd.f32 1.0, %v804_v37  ;;  %v447_v48 = vmul.f32 %v446_v47, %v1097_v52  ;;  %v458_v41 = vmul.f32 %v457_v27, %v1097_v52  ;;  %v658_v59 = vpack.c.bf16 %v606_v24, %v605_v23  ;;  %v586_v27 = vld [vmem:[#allocation4 + $0x58] sm:$0xff] }
  0xe6   :  { %v1201_v53 = vpop.eup %830  ;;  %v483_v16 = vmul.f32 %v482_v30, %v1173_v11  ;;  %v494_v56 = vmul.f32 %v493_v43, %v1173_v11  ;;  %v1205_v44 = vmin.f32 %v519_v39, 16.0  ;;  %v649_v58 = vpack.c.bf16 %v588_v10, %v587_v28 }
  0xe7   :  { %v1207_v6 = vadd.f32 1.0, %v805_v25  ;;  %v1210_v35 = vadd.f32 %v1141_v29, %v345_v54  ;;  %v410_v46 = vadd.f32 1.1283791, %v409_v26  ;;  %v423_v61 = vmul.f32 %v1201_v53, %v1170_v5  ;;  %693 = vmatpush.bf16.msrb.mxu1 %v658_v59  ;;  %v585_v26 = vld [vmem:[#allocation4 + $0x50] sm:$0xff] }
  0xe8   :  { %v459_v2 = vadd.f32 0.4994258, %v458_v41  ;;  %v484_v7 = vadd.f32 0.0036580483, %v483_v16  ;;  %v495_v8 = vadd.f32 0.014752088, %v494_v56  ;;  %680 = vmatpush.bf16.msrb.mxu0 %v649_v58  ;;  %v657_v15 = vpack.c.bf16 %v604_v12, %v603_v50 }
  0xe9   :  { %v1216_v37 = vmul.f32 %v1197_v31, %v1159_v57  ;;  %v424_v47 = vsub.f32 1.0, %v423_v61  ;;  %v431_v17 = vand.u32 2147483647, %v1170_v5  ;;  %v521_v20 = vmul.f32 2.1237322e-06, %v1205_v44  ;;  %v601_v58 = vld [vmem:[#allocation4 + $0xd0] sm:$0xff] }
  0xea   :  { %v448_v23 = vadd.f32 0.18741608, %v447_v48  ;;  %v460_v24 = vmul.f32 %v459_v2, %v1097_v52  ;;  %v496_v25 = vmul.f32 %v495_v8, %v1173_v11  ;;  %v532_v54 = vmul.f32 3.8918573e-05, %v1205_v44  ;;  %v636_v8 = vld [vmem:[#allocation4 + $0x1e8] sm:$0xff] }
  0xeb   :  { %v425_v28 = vmul.f32 %v1201_v53, %v424_v47  ;;  %vm428_vm10 = vweird.f32 %v1201_v53  ;;  %v485_v10 = vmul.f32 %v484_v7, %v1173_v11  ;;  %694 = vmatpush.bf16.msrb.mxu1 %v657_v15  ;;  %v666_v30 = vpack.c.bf16 %v622_v63, %v621_v62  ;;  %v619_v63 = vld [vmem:[#allocation4 + $0x160] sm:$0xff] }
  0xec   :  { %vm1228_vm11 = vcmp.eq.f32.partialorder %v351_v3, 8.507059e+37  ;;  %v1232_v39 = vadd.f32 1.0, %v460_v24  ;;  %v497_v48 = vadd.f32 0.112945676, %v496_v25  ;;  %v522_v41 = vadd.f32 0.00028619796, %v521_v20 }
  0xed   :  { %v674_v59 = vpack.c.bf16 %v638_v21, %v637_v0  ;;  %v426_v12 = vadd.f32 %v1201_v53, %v425_v28  ;;  %v433_v3 = vand.u32 2147483648, %v1170_v5  ;;  %v533_v16 = vadd.f32 0.001143296, %v532_v54  ;;  %707 = vmatpush.bf16.msrb.mxu2 %v666_v30  ;;  %v620_v0 = vld [vmem:[#allocation4 + $0x168] sm:$0xff]  ;;  %v635_v7 = vld [vmem:[#allocation4 + $0x1e0] sm:$0xff] }
  0xee   :  { %v648_v56 = vpack.c.bf16 %v586_v27, %v585_v26  ;;  %v1245_v61 = vmul.f32 %v559_v33, %v1065_v19  ;;  %v1247_v62 = vor.u32 1.1754944e-38, %v393_v60  ;;  %vm427_vm13 = vweird.f32 %v1170_v5  ;;  %v583_v20 = vld [vmem:[#allocation4 + $0x40] sm:$0xff]  ;;  %v584_v21 = vld [vmem:[#allocation4 + $0x48] sm:$0xff]  ;;  %v582_v19 = vld [vmem:[#allocation4 + $0x38] sm:$0xff] }
  0xef   :  { %832 = vrcp.f32 %v1232_v39  ;;  %721 = vmatpush.bf16.msrb.mxu3 %v674_v59  ;;  %v350_v2 = vsel %vm1238_vm12, %v1141_v29, %v1210_v35  ;;  %vm1257_vm14 = vmor %vm427_vm13, %vm428_vm10  ;;  %v449_v60 = vmul.f32 %v448_v23, %v1097_v52  ;;  %v486_v5 = vadd.f32 0.05243302, %v485_v10  ;;  %v599_v25 = vld [vmem:[#allocation4 + $0xc0] sm:$0xff]  ;;  %v600_v54 = vld [vmem:[#allocation4 + $0xc8] sm:$0xff] }
  0xf0   :  { %v498_v33 = vmul.f32 %v497_v48, %v1173_v11  ;;  %681 = vmatpush.bf16.msrb.mxu0 %v648_v56  ;;  %v384_v15 = vsub.f32 1.0, %v1216_v37  ;;  %v430_v29 = vsel %vm1257_vm14, %v1201_v53, %v426_v12  ;;  %v523_v35 = vmul.f32 %v522_v41, %v1205_v44  ;;  %v617_v41 = vld [vmem:[#allocation4 + $0x150] sm:$0xff]  ;;  %v618_v59 = vld [vmem:[#allocation4 + $0x158] sm:$0xff] }
  0xf1   :  { %v534_v47 = vmul.f32 %v533_v16, %v1205_v44  ;;  %v411_v52 = vmul.f32 %v410_v46, %v1024_v22  ;;  %vm432_vm15 = vcmp.eq.f32.partialorder %v431_v17, 8.507059e+37  ;;  %v434_v23 = vor.u32 1.1754944e-38, %v433_v3  ;;  %v633_v3 = vld [vmem:[#allocation4 + $0x1d0] sm:$0xff]  ;;  %v634_v16 = vld [vmem:[#allocation4 + $0x1d8] sm:$0xff] }
  0xf2   :  { %v499_v24 = vadd.f32 0.4994258, %v498_v33  ;;  %v656_v27 = vpack.c.bf16 %v602_v49, %v601_v58  ;;  %v665_v37 = vpack.c.bf16 %v620_v0, %v619_v63  ;;  %v673_v28 = vpack.c.bf16 %v636_v8, %v635_v7  ;;  %v581_v0 = vld [vmem:[#allocation4 + $0x30] sm:$0xff]  ;;  %v615_v7 = vld [vmem:[#allocation4 + $0x140] sm:$0xff] }
  0xf3   :  { %v535_v26 = vadd.f32 0.014752088, %v534_v47  ;;  %v435_v10 = vsel %vm432_vm15, %v434_v23, %v430_v29  ;;  %v450_v30 = vadd.f32 1.1283791, %v449_v60  ;;  %v487_v53 = vmul.f32 %v486_v5, %v1173_v11  ;;  %v616_v47 = vld [vmem:[#allocation4 + $0x148] sm:$0xff] }
  0xf4   :  { %v500_v48 = vmul.f32 %v499_v24, %v1173_v11  ;;  %v524_v22 = vadd.f32 0.0036580483, %v523_v35  ;;  %695 = vmatpush.bf16.msrb.mxu1 %v656_v27  ;;  %708 = vmatpush.bf16.msrb.mxu2 %v665_v37  ;;  %v647_v17 = vpack.c.bf16 %v584_v21, %v583_v20  ;;  %v655_v12 = vpack.c.bf16 %v600_v54, %v599_v25  ;;  %v631_v20 = vld [vmem:[#allocation4 + $0x1c0] sm:$0xff]  ;;  %v632_v21 = vld [vmem:[#allocation4 + $0x1c8] sm:$0xff] }
  0xf5   :  { %v1272_v50 = vpop.eup %832  ;;  %v536_v46 = vmul.f32 %v535_v26, %v1205_v44  ;;  %v1278_v56 = vsel %vm1228_vm11, %v1175_v13, %v350_v2  ;;  %v1281_v58 = vmul.f32 %v1197_v31, %v384_v15  ;;  %v471_v63 = vand.u32 2147483647, %v1232_v39  ;;  %722 = vmatpush.bf16.msrb.mxu3 %v673_v28  ;;  %v597_v13 = vld [vmem:[#allocation4 + $0xb0] sm:$0xff]  ;;  %v598_v2 = vld [vmem:[#allocation4 + $0xb8] sm:$0xff]  ;;  %v579_v24 = vld [vmem:[#allocation4 + $0x20] sm:$0xff] }
  0xf6   :  { %v463_v49 = vmul.f32 %v1272_v50, %v1232_v39  ;;  %v1286_v60 = vmul.f32 %v435_v10, %v411_v52  ;;  %v1288_v5 = vadd.f32 1.0, %v500_v48  ;;  %682 = vmatpush.bf16.msrb.mxu0 %v647_v17  ;;  %v664_v43 = vpack.c.bf16 %v618_v59, %v617_v41  ;;  %v580_v25 = vld [vmem:[#allocation4 + $0x28] sm:$0xff]  ;;  %v595_v54 = vld [vmem:[#allocation4 + $0xa0] sm:$0xff]  ;;  %v613_v28 = vld [vmem:[#allocation4 + $0x130] sm:$0xff] }
  0xf7   :  { %v537_v33 = vadd.f32 0.112945676, %v536_v46  ;;  %v451_v8 = vmul.f32 %v450_v30, %v1054_v9  ;;  %v473_v29 = vand.u32 2147483648, %v1232_v39  ;;  %v672_v35 = vpack.c.bf16 %v634_v16, %v633_v3  ;;  %v596_v37 = vld [vmem:[#allocation4 + $0xa8] sm:$0xff]  ;;  %v614_v10 = vld [vmem:[#allocation4 + $0x138] sm:$0xff]  ;;  %v629_v59 = vld [vmem:[#allocation4 + $0x1b0] sm:$0xff] }
  0xf8   :  { %v464_v15 = vsub.f32 1.0, %v463_v49  ;;  %vm467_vm0 = vweird.f32 %v1232_v39  ;;  %v488_v52 = vadd.f32 0.18741608, %v487_v53  ;;  %834 = vrcp.f32 %v1288_v5  ;;  %696 = vmatpush.bf16.msrb.mxu1 %v655_v12  ;;  %709 = vmatpush.bf16.msrb.mxu2 %v664_v43  ;;  %v577_v16 = vld [vmem:[#allocation4 + $0x10] sm:$0xff] }
  0xf9   :  { %v525_v23 = vmul.f32 %v524_v22, %v1205_v44  ;;  %vm468_vm1 = vweird.f32 %v1272_v50  ;;  %v538_v26 = vmul.f32 %v537_v33, %v1205_v44  ;;  %723 = vmatpush.bf16.msrb.mxu3 %v672_v35  ;;  %v646_v27 = vpack.c.bf16 %v582_v19, %v581_v0  ;;  %v630_v22 = vld [vmem:[#allocation4 + $0x1b8] sm:$0xff]  ;;  %v593_v43 = vld [vmem:[#allocation4 + $0x90] sm:$0xff]  ;;  %v612_v35 = vld [vmem:[#allocation4 + $0x128] sm:$0xff] }
  0xfa   :  { %v465_v9 = vmul.f32 %v1272_v50, %v464_v15  ;;  %v808_v30 = vclamps-f32 %v1286_v60, 1.0  ;;  %vm1299_vm2 = vcmp.eq.f32.partialorder %v471_v63, 8.507059e+37  ;;  %v654_v48 = vpack.c.bf16 %v598_v2, %v597_v13  ;;  %vm1309_vm4 = vmor %vm467_vm0, %vm468_vm1  ;;  %v578_v33 = vld [vmem:[#allocation4 + $0x18] sm:$0xff] }
  0xfb   :  { %v663_v41 = vpack.c.bf16 %v616_v47, %v615_v7  ;;  %v474_v17 = vor.u32 1.1754944e-38, %v473_v29  ;;  %v539_v12 = vadd.f32 0.4994258, %v538_v26  ;;  %683 = vmatpush.bf16.msrb.mxu0 %v646_v27  ;;  %v671_v3 = vpack.c.bf16 %v632_v21, %v631_v20  ;;  %v594_v15 = vld [vmem:[#allocation4 + $0x98] sm:$0xff]  ;;  %v611_v29 = vld [vmem:[#allocation4 + $0x120] sm:$0xff] }
  0xfc   :  { %v466_v46 = vadd.f32 %v1272_v50, %v465_v9  ;;  %vm387_vm3 = vweird.f32 %v1159_v57  ;;  %v526_v63 = vadd.f32 0.05243302, %v525_v23  ;;  %697 = vmatpush.bf16.msrb.mxu1 %v654_v48  ;;  %v645_v0 = vpack.c.bf16 %v580_v25, %v579_v24  ;;  %v609_v48 = vld [vmem:[#allocation4 + $0x110] sm:$0xff] }
  0xfd   :  { %710 = vmatpush.bf16.msrb.mxu2 %v663_v41  ;;  %v653_v19 = vpack.c.bf16 %v596_v37, %v595_v54  ;;  %v662_v60 = vpack.c.bf16 %v614_v10, %v613_v28  ;;  %v489_v2 = vmul.f32 %v488_v52, %v1173_v11  ;;  %v540_v39 = vmul.f32 %v539_v12, %v1205_v44  ;;  %v627_v11 = vld [vmem:[#allocation4 + $0x1a0] sm:$0xff]  ;;  %v628_v52 = vld [vmem:[#allocation4 + $0x1a8] sm:$0xff]  ;;  %v610_v41 = vld [vmem:[#allocation4 + $0x118] sm:$0xff] }
  0xfe   :  { %v470_v13 = vsel %vm1309_vm4, %v1272_v50, %v466_v46  ;;  %724 = vmatpush.bf16.msrb.mxu3 %v671_v3  ;;  %v670_v7 = vpack.c.bf16 %v630_v22, %v629_v59  ;;  %v1318_v47 = vpop.eup %834  ;;  %v1322_v20 = vmul.f32 %v1278_v56, %v1186_v18  ;;  %vm388_vm5 = vweird.f32 %v1197_v31  ;;  %v575_v18 = vld [vmem:[#allocation4] sm:$0xff]  ;;  %v576_v37 = vld [vmem:[#allocation4 + $0x8] sm:$0xff]  ;;  %v626_v12 = vld [vmem:[#allocation4 + $0x198] sm:$0xff] }
  0xff   :  { %v563_v21 = vadd.f32 1.0, %v808_v30  ;;  %v475_v50 = vsel %vm1299_vm2, %v474_v17, %v470_v13  ;;  %v1329_v23 = vadd.f32 %v1197_v31, %v1281_v58  ;;  %v503_v25 = vmul.f32 %v1318_v47, %v1288_v5  ;;  %684 = vmatpush.bf16.msrb.mxu0 %v645_v0  ;;  %v591_v28 = vld [vmem:[#allocation4 + $0x80] sm:$0xff]  ;;  %v592_v10 = vld [vmem:[#allocation4 + $0x88] sm:$0xff]  ;;  %v625_v17 = vld [vmem:[#allocation4 + $0x190] sm:$0xff] }
 0x100   :  { %v476_v24 = vmul.f32 %v475_v50, %v451_v8  ;;  %v644_v54 = vpack.c.bf16 %v578_v33, %v577_v16  ;;  %v527_v56 = vmul.f32 %v526_v63, %v1205_v44  ;;  %v1334_v9 = vadd.f32 1.0, %v540_v39  ;;  %698 = vmatpush.bf16.msrb.mxu1 %v653_v19  ;;  %vm1348_vm7 = vmor %vm387_vm3, %vm388_vm5  ;;  %v608_v13 = vld [vmem:[#allocation4 + $0x108] sm:$0xff] }
 0x101   :  { %711 = vmatpush.bf16.msrb.mxu2 %v662_v60  ;;  %v652_v26 = vpack.c.bf16 %v594_v15, %v593_v43  ;;  %v661_v27 = vpack.c.bf16 %v612_v35, %v611_v29  ;;  %v490_v30 = vadd.f32 1.1283791, %v489_v2  ;;  %v504_v8 = vsub.f32 1.0, %v503_v25  ;;  %v623_v15 = vld [vmem:[#allocation4 + $0x180] sm:$0xff]  ;;  %v624_v29 = vld [vmem:[#allocation4 + $0x188] sm:$0xff] }
 0x102   :  { %v809_v58 = vclamps-f32 %v476_v24, 1.0  ;;  %725 = vmatpush.bf16.msrb.mxu3 %v670_v7  ;;  %v669_v53 = vpack.c.bf16 %v628_v52, %v627_v11  ;;  %v571_v59 = vmul.f32 %v563_v21, %v1081_v34  ;;  %v511_v22 = vand.u32 2147483647, %v1288_v5 }
 0x103   :  { %v513_v46 = vand.u32 2147483648, %v1288_v5  ;;  %836 = vrcp.f32 %v1334_v9  ;;  %v505_v16 = vmul.f32 %v1318_v47, %v504_v8  ;;  %vm508_vm6 = vweird.f32 %v1318_v47  ;;  %685 = vmatpush.bf16.msrb.mxu0 %v644_v54 }
 0x104   :  { %v564_v3 = vadd.f32 1.0, %v809_v58  ;;  %v643_v49 = vpack.c.bf16 %v576_v37, %v575_v18  ;;  %v568_v63 = vmul.f32 %v1207_v6, %v1077_v32  ;;  %v528_v0 = vadd.f32 0.18741608, %v527_v56  ;;  %699 = vmatpush.bf16.msrb.mxu1 %v652_v26  ;;  %v607_v6 = vld [vmem:[#allocation4 + $0x100] sm:$0xff] }
 0x105   :  { %712 = vmatpush.bf16.msrb.mxu2 %v661_v27  ;;  %v651_v34 = vpack.c.bf16 %v592_v10, %v591_v28  ;;  %v660_v19 = vpack.c.bf16 %v610_v41, %v609_v48  ;;  %v506_v43 = vadd.f32 %v1318_v47, %v505_v16  ;;  %vm507_vm8 = vweird.f32 %v1288_v5 }
 0x106   :  { %v572_v33 = vmul.f32 %v564_v3, %v1083_v38  ;;  %726 = vmatpush.bf16.msrb.mxu3 %v669_v53  ;;  %v668_v32 = vpack.c.bf16 %v626_v12, %v625_v17  ;;  %v806_v2 = vclamps-f32 %v1322_v20, 1.0  ;;  %v390_v39 = vsel %vm1348_vm7, %v1197_v31, %v1329_v23  ;;  %vm509_vm9 = vmor %vm507_vm8, %vm508_vm6 }
 0x107   :  { %v514_v7 = vor.u32 1.1754944e-38, %v513_v46  ;;  %v639_v38 = vpack.c.bf16 %v571_v59, %v1245_v61  ;;  %v491_v5 = vmul.f32 %v490_v30, %v1153_v36  ;;  %v510_v35 = vsel %vm509_vm9, %v1318_v47, %v506_v43  ;;  %686 = vmatpush.bf16.msrb.mxu0 %v643_v49 }
 0x108   :  { %vm512_vm10 = vcmp.eq.f32.partialorder %v511_v22, 8.507059e+37  ;;  %v640_v20 = vpack.c.bf16 %v572_v33, %v568_v63  ;;  %vm392_vm11 = vcmp.eq.f32.partialorder %v391_v14, 8.507059e+37  ;;  %v529_v50 = vmul.f32 %v528_v0, %v1205_v44  ;;  %700 = vmatpush.bf16.msrb.mxu1 %v651_v34 }
 0x109   :  { %v837_v21 = vpop.eup %836  ;;  %v515_v31 = vsel %vm512_vm10, %v514_v7, %v510_v35  ;;  %713 = vmatpush.bf16.msrb.mxu2 %v660_v19  ;;  %v659_v11 = vpack.c.bf16 %v608_v13, %v607_v6  ;;  %v395_v61 = vsel %vm392_vm11, %v1247_v62, %v390_v39  ;;  %v667_v47 = vpack.c.bf16 %v624_v29, %v623_v15  ;;  %v845_v7 = vld [vmem:[%s1401_s0 + $0x8] sm:$0xff] }
 0x10a   :  { %v516_v52 = vmul.f32 %v515_v31, %v491_v5  ;;  %v543_v36 = vmul.f32 %v837_v21, %v1334_v9  ;;  %727 = vmatpush.bf16.msrb.mxu3 %v668_v32  ;;  %v371_v23 = vmul.f32 %v1177_v4, %v1005_v1  ;;  %687 = vmatmul.bf16.vlgmr.msrb.gmra.mxu0 %v639_v38  ;;  %v225_v57 = vmul.f32 0.5, %v988_v51  ;;  %v844_v32 = vld [vmem:[%s1401_s0] sm:$0xff] }
 0x10b   :  { %v561_v14 = vadd.f32 1.0, %v806_v2  ;;  %701 = vmatmul.bf16.vlgmr.msrb.gmra.mxu1 %v640_v20  ;;  %v229_v54 = vmul.f32 0.5, %v1087_v40  ;;  %v530_v18 = vadd.f32 1.1283791, %v529_v50  ;;  %v553_v62 = vand.u32 2147483648, %v1334_v9 }
 0x10c   :  { %v810_v24 = vclamps-f32 %v516_v52, 1.0  ;;  %v544_v25 = vsub.f32 1.0, %v543_v36  ;;  %v396_v44 = vmul.f32 %v395_v61, %v371_v23  ;;  %vm548_vm12 = vweird.f32 %v837_v21 }
 0x10d   :  { %714 = vmatpush.bf16.msrb.mxu2 %v659_v11  ;;  %v551_v27 = vand.u32 2147483647, %v1334_v9  ;;  %v569_v1 = vmul.f32 %v561_v14, %v225_v57  ;;  %vm547_vm13 = vweird.f32 %v1334_v9  ;;  %v554_v28 = vor.u32 1.1754944e-38, %v553_v62 }
 0x10e   :  { %v565_v56 = vadd.f32 1.0, %v810_v24  ;;  %v545_v26 = vmul.f32 %v837_v21, %v544_v25  ;;  %728 = vmatpush.bf16.msrb.mxu3 %v667_v47  ;;  %v807_v37 = vclamps-f32 %v396_v44, 1.0  ;;  %vm549_vm14 = vmor %vm547_vm13, %vm548_vm12  ;;  %v531_v40 = vmul.f32 %v530_v18, %v1181_v42  ;;  %v819_v42 = vld [vmem:[%s1405_s4] ss:$0 sm:$0xff] }
 0x10f   :  { %vm552_vm15 = vcmp.eq.f32.partialorder %v551_v27, 8.507059e+37  ;;  %v226_v41 = vmul.f32 0.5, %v994_v55  ;;  %v230_v59 = vmul.f32 0.5, %v1091_v45  ;;  %v904_v15 = vmov 128.0  }
 0x110   :  { %v573_v4 = vmul.f32 %v565_v56, %v229_v54  ;;  %v546_v51 = vadd.f32 %v837_v21, %v545_v26  ;;  %v562_v53 = vadd.f32 1.0, %v807_v37  ;;  %838 = vrcp.f32 %v904_v15 }
 0x112   :  { %v550_v10 = vsel %vm549_vm14, %v837_v21, %v546_v51  ;;  %v641_v58 = vpack.c.bf16 %v573_v4, %v569_v1  ;;  %v570_v46 = vmul.f32 %v562_v53, %v226_v41 }
 0x113   :  { %v555_v30 = vsel %vm552_vm15, %v554_v28, %v550_v10  ;;  %v820_v28 = vld [vmem:[%s1406_s5] ss:$0 sm:$0xff] }
 0x114   :  { %v556_v8 = vmul.f32 %v555_v30, %v531_v40  ;;  %715 = vmatmul.bf16.vlgmr.msrb.gmra.mxu2 %v641_v58  ;;  %v821_v58 = vld [vmem:[%s1407_s6] ss:$0 sm:$0xff] }
 0x116   :  { %v811_v48 = vclamps-f32 %v556_v8, 1.0  ;;  %v839_v29 = vpop.eup %838 }
 0x117   :  { %v744_v5 = vmul.f32 128.0, %v839_v29  ;;  %vm748_vm0 = vweird.f32 %v839_v29 }
 0x118   :  { %v566_v22 = vadd.f32 1.0, %v811_v48 }
 0x119   :  { %v745_v35 = vsub.f32 1.0, %v744_v5 }
 0x11a   :  { %v574_v9 = vmul.f32 %v566_v22, %v230_v59 }
 0x11b   :  { %v746_v20 = vmul.f32 %v839_v29, %v745_v35 }
 0x11c   :  { %v642_v17 = vpack.c.bf16 %v574_v9, %v570_v46 }
 0x11d   :  { %v747_v21 = vadd.f32 %v839_v29, %v746_v20 }
 0x11e   :  { %729 = vmatmul.bf16.vlgmr.msrb.gmra.mxu3 %v642_v17 }
 0x11f   :  { %v749_v31 = vsel %vm748_vm0, %v839_v29, %v747_v21 }
 0x187   :  { %v688_v12 = vpop.f32.mrf.mxu0 }
 0x188   :  { %v689_v3 = vadd.f32 %v819_v42, %v688_v12  ;;  %v702_v16 = vpop.f32.mrf.mxu1 }
 0x18a   :  { %v703_v63 = vadd.f32 %v702_v16, %v689_v3 }
 0x18f   :  { %v690_v0 = vpop.f32.mrf.mxu0 }
 0x190   :  { %v691_v19 = vadd.f32 %v819_v42, %v690_v0  ;;  %v704_v45 = vpop.f32.mrf.mxu1 }
 0x192   :  { %v705_v43 = vadd.f32 %v704_v45, %v691_v19 }
 0x197   :  { %v716_v49 = vpop.f32.mrf.mxu2 }
 0x198   :  { %v717_v34 = vadd.f32 %v716_v49, %v703_v63 }
 0x19f   :  { %v718_v33 = vpop.f32.mrf.mxu2 }
 0x1a0   :  { %v719_v13 = vadd.f32 %v718_v33, %v705_v43 }
 0x1a1   :  { %v730_v55 = vpop.f32.mrf.mxu3 }
 0x1a2   :  { %v731_v60 = vadd.f32 %v730_v55, %v717_v34 }
 0x1a4   :  { %v735_v6 = vadd.f32 %v844_v32, %v731_v60 }
 0x1a6   :  { %739 = vadd.xlane.f32.xlu0 %v735_v6 }
 0x1a9   :  { %v732_v2 = vpop.f32.mrf.mxu3 }
 0x1aa   :  { %v733_v39 = vadd.f32 %v732_v2, %v719_v13 }
 0x1ac   :  { %v736_v38 = vadd.f32 %v845_v7, %v733_v39 }
 0x1ae   :  { %741 = vadd.xlane.f32.xlu0 %v736_v38 }
 0x219   :  { %v740_v50 = vpop.xlane.xlu0 %739 }
 0x21a   :  { %v750_v11 = vmul.f32 %v749_v31, %v740_v50 }
 0x21c   :  { %v752_v61 = vsub.f32 %v735_v6, %v750_v11 }
 0x21e   :  { %v754_v52 = vmul.f32 %v752_v61, %v752_v61 }
 0x220   :  { %756 = vadd.xlane.f32.xlu1 %v754_v52 }
 0x221   :  { %v742_v36 = vpop.xlane.xlu0 %741 }
 0x222   :  { %v751_v47 = vmul.f32 %v749_v31, %v742_v36 }
 0x224   :  { %v753_v23 = vsub.f32 %v736_v38, %v751_v47 }
 0x226   :  { %v755_v57 = vmul.f32 %v753_v23, %v753_v23 }
 0x228   :  { %758 = vadd.xlane.f32.xlu1 %v755_v57 }
 0x293   :  { %v757_v14 = vpop.xlane.xlu1 %756 }
 0x294   :  { %v760_v24 = vmul.f32 %v757_v14, %v749_v31 }
 0x296   :  { %v762_v25 = vadd.f32 1e-12, %v760_v24 }
 0x298   :  { %840 = vrsqrt.f32 %v762_v25  ;;  %vm770_vm2 = vweird.f32 %v762_v25 }
 0x29b   :  { %v759_v44 = vpop.xlane.xlu1 %758 }
 0x29c   :  { %v761_v54 = vmul.f32 %v759_v44, %v749_v31 }
 0x29e   :  { %v841_v18 = vpop.eup %840  ;;  %v763_v62 = vadd.f32 1e-12, %v761_v54 }
 0x29f   :  { %v765_v56 = vmul.f32 %v841_v18, %v762_v25  ;;  %vm771_vm1 = vweird.f32 %v841_v18 }
 0x2a0   :  { %842 = vrsqrt.f32 %v763_v62  ;;  %vm772_vm3 = vmor %vm770_vm2, %vm771_vm1  ;;  %vm780_vm5 = vweird.f32 %v763_v62 }
 0x2a1   :  { %v766_v26 = vmul.f32 %v841_v18, %v765_v56 }
 0x2a3   :  { %v767_v27 = vmul.f32 0.5, %v766_v26 }
 0x2a5   :  { %v768_v1 = vsub.f32 1.5, %v767_v27 }
 0x2a6   :  { %v843_v4 = vpop.eup %842 }
 0x2a7   :  { %v769_v51 = vmul.f32 %v841_v18, %v768_v1  ;;  %v775_v37 = vmul.f32 %v843_v4, %v763_v62  ;;  %vm781_vm4 = vweird.f32 %v843_v4 }
 0x2a8   :  { %vm782_vm6 = vmor %vm780_vm5, %vm781_vm4 }
 0x2a9   :  { %v773_v40 = vsel %vm772_vm3, %v841_v18, %v769_v51  ;;  %v776_v10 = vmul.f32 %v843_v4, %v775_v37 }
 0x2aa   :  { %v784_v30 = vmul.f32 %v773_v40, %v752_v61 }
 0x2ab   :  { %v777_v8 = vmul.f32 0.5, %v776_v10 }
 0x2ac   :  { %v789_v53 = vmul.f32 %v820_v28, %v784_v30 }
 0x2ad   :  { %v778_v48 = vsub.f32 1.5, %v777_v8 }
 0x2ae   :  { %v794_v41 = vadd.f32 %v821_v58, %v789_v53 }
 0x2af   :  { %v779_v59 = vmul.f32 %v843_v4, %v778_v48 }
 0x2b0   :  { %796 = vst [vmem:[%s1408_s7] sm:$0xff] %v794_v41 }
 0x2b1   :  { %v783_v22 = vsel %vm782_vm6, %v843_v4, %v779_v59 }
 0x2b2   :  { %v785_v46 = vmul.f32 %v783_v22, %v753_v23 }
 0x2b4   :  { %v790_v9 = vmul.f32 %v820_v28, %v785_v46 }
 0x2b6   :  { %v795_v17 = vadd.f32 %v821_v58, %v790_v9 }
 0x2b8   :  { %797 = vst [vmem:[%s1408_s7 + $0x8] sm:$0xff] %v795_v17 }
 0x2b9   :  { %802 = vsyncpa [#allocation3], 1 }
 0x2ba   :  { %803 = vsyncpa [#allocation5], 1 }

// kernel: bert_forward.7
= control target key start
LH: loop header
LB: loop body
LE: loop exit
PB: predicated region body
PF: predicated region fallthrough
CT: control target
= control target key end

     0   :  { %13 = vsyncpa [#allocation3], 0  ;;  %s1012_s30 = smov [#allocation2]   ;;  %s1013_s10 = smov 384   ;;  %s1305_s0 = inlined_call_operand.vmem [shape: f32[16,128], index: 0, kind: input, shape index: {}]   ;;  %s1306_s1 = inlined_call_operand.hbm [shape: f32[128,384], index: 1, kind: input, shape index: {}]   ;;  %s1307_s2 = inlined_call_operand.vmem [shape: f32[1,384], index: 2, kind: input, shape index: {}]   ;;  %s1308_s3 = inlined_call_operand.vmem [shape: f32[128,128], index: 3, kind: input, shape index: {}]   ;;  %s1309_s4 = inlined_call_operand.vmem [shape: f32[1,128], index: 4, kind: input, shape index: {}]   ;;  %s1310_s5 = inlined_call_operand.vmem [shape: f32[1,128], index: 5, kind: input, shape index: {}]   ;;  %s1311_s6 = inlined_call_operand.vmem [shape: f32[1,128], index: 6, kind: input, shape index: {}]   ;;  %s1312_s7 = inlined_call_operand.vmem [shape: f32[2,1,8], index: 7, kind: input, shape index: {}]   ;;  %s1313_s8 = inlined_call_operand.vmem [shape: f32[16,128], index: 8, kind: output, shape index: {}]  }
   0x1   :  { %s20_s29 = sshll.u32 %s1306_s1, 4  ;;  %s22_s9 = sshll.u32 %s1012_s30, 4  ;;  %s21_s29 = int_to_ptr.hbm [resolvable:$true] %s20_s29  ;;  %s23_s9 = int_to_ptr.vmem [resolvable:$true] %s22_s9 }
   0x2   :  { %s1014_s11 = smov 24  }
   0x3   :  { %28 = dma.hbm_to_vmem [thread:$0]  %s21_s29, 6144, %s23_s9, [#allocation3], %s1013_s10, %s1013_s10, %s1014_s11  }
   0x4   :  { %1010 = dma.done.wait [#allocation3], 6144  }
   0x5   :  { %1011 = vsyncadd [#allocation3], 4294961152  ;;  %v91_v0 = vld [vmem:[#allocation2 + $0x158] sm:$0xff]  ;;  %v94_v1 = vld [vmem:[#allocation2 + $0x170] sm:$0xff]  ;;  %vm177_vm0 = vcmask 261120   ;;  %s1017_s17 = smov 32  }
   0x6   :  { %v85_v2 = vld [vmem:[#allocation2 + $0x128] sm:$0xff]  ;;  %v119_v3 = vpack.c.bf16 %v94_v1, %v91_v0  ;;  %v88_v4 = vld [vmem:[#allocation2 + $0x140] sm:$0xff]  ;;  %v90_v5 = vld [vmem:[#allocation2 + $0x150] sm:$0xff]  ;;  %vm226_vm1 = vcmask 64512   ;;  %vm282_vm2 = vcmask 1043456  }
   0x7   :  { %v93_v6 = vld [vmem:[#allocation2 + $0x168] sm:$0xff]  ;;  %v84_v8 = vld [vmem:[#allocation2 + $0x120] sm:$0xff]  ;;  %v116_v9 = vpack.c.bf16 %v88_v4, %v85_v2  ;;  %v87_v10 = vld [vmem:[#allocation2 + $0x138] sm:$0xff] }
   0x8   :  { %v118_v7 = vpack.c.bf16 %v93_v6, %v90_v5  ;;  %143 = vmatpush.bf16.msra.mxu1 %v119_v3  ;;  %v79_v11 = vld [vmem:[#allocation2 + $0xf8] sm:$0xff]  ;;  %v82_v12 = vld [vmem:[#allocation2 + $0x110] sm:$0xff]  ;;  %v115_v13 = vpack.c.bf16 %v87_v10, %v84_v8  ;;  %v81_v15 = vld [vmem:[#allocation2 + $0x108] sm:$0xff] }
   0x9   :  { %v78_v14 = vld [vmem:[#allocation2 + $0xf0] sm:$0xff]  ;;  %v113_v16 = vpack.c.bf16 %v82_v12, %v79_v11  ;;  %v73_v17 = vld [vmem:[#allocation2 + $0xc8] sm:$0xff]  ;;  %v76_v18 = vld [vmem:[#allocation2 + $0xe0] sm:$0xff] }
   0xa   :  { %129 = vmatpush.bf16.msra.mxu0 %v118_v7  ;;  %v112_v19 = vpack.c.bf16 %v81_v15, %v78_v14  ;;  %v72_v20 = vld [vmem:[#allocation2 + $0xc0] sm:$0xff]  ;;  %v75_v21 = vld [vmem:[#allocation2 + $0xd8] sm:$0xff]  ;;  %v110_v22 = vpack.c.bf16 %v76_v18, %v73_v17  ;;  %v70_v24 = vld [vmem:[#allocation2 + $0xb0] sm:$0xff] }
   0xb   :  { %v67_v23 = vld [vmem:[#allocation2 + $0x98] sm:$0xff]  ;;  %v109_v25 = vpack.c.bf16 %v75_v21, %v72_v20  ;;  %v66_v26 = vld [vmem:[#allocation2 + $0x90] sm:$0xff]  ;;  %v69_v27 = vld [vmem:[#allocation2 + $0xa8] sm:$0xff] }
   0xc   :  { %144 = vmatpush.bf16.msra.mxu1 %v116_v9  ;;  %v107_v28 = vpack.c.bf16 %v70_v24, %v67_v23  ;;  %v61_v29 = vld [vmem:[#allocation2 + $0x68] sm:$0xff]  ;;  %v64_v30 = vld [vmem:[#allocation2 + $0x80] sm:$0xff]  ;;  %v106_v31 = vpack.c.bf16 %v69_v27, %v66_v26  ;;  %v63_v33 = vld [vmem:[#allocation2 + $0x78] sm:$0xff] }
   0xd   :  { %v60_v32 = vld [vmem:[#allocation2 + $0x60] sm:$0xff]  ;;  %v104_v34 = vpack.c.bf16 %v64_v30, %v61_v29  ;;  %v55_v35 = vld [vmem:[#allocation2 + $0x38] sm:$0xff]  ;;  %v58_v36 = vld [vmem:[#allocation2 + $0x50] sm:$0xff] }
   0xe   :  { %130 = vmatpush.bf16.msra.mxu0 %v115_v13  ;;  %v103_v37 = vpack.c.bf16 %v63_v33, %v60_v32  ;;  %v54_v38 = vld [vmem:[#allocation2 + $0x30] sm:$0xff]  ;;  %v57_v39 = vld [vmem:[#allocation2 + $0x48] sm:$0xff]  ;;  %v101_v40 = vpack.c.bf16 %v58_v36, %v55_v35  ;;  %v52_v42 = vld [vmem:[#allocation2 + $0x20] sm:$0xff] }
   0xf   :  { %v49_v41 = vld [vmem:[#allocation2 + $0x8] sm:$0xff]  ;;  %v100_v43 = vpack.c.bf16 %v57_v39, %v54_v38  ;;  %v48_v44 = vld [vmem:[#allocation2] sm:$0xff]  ;;  %v51_v45 = vld [vmem:[#allocation2 + $0x18] sm:$0xff] }
  0x10   :  { %145 = vmatpush.bf16.msra.mxu1 %v113_v16  ;;  %v98_v46 = vpack.c.bf16 %v52_v42, %v49_v41  ;;  %v1070_v47 = vld [vmem:[%s1305_s0] sm:$0xff]  ;;  %v1075_v48 = vld [vmem:[%s1305_s0 + $0x8] sm:$0xff]  ;;  %v97_v49 = vpack.c.bf16 %v51_v45, %v48_v44  ;;  %s1015_s0 = smov 64   ;;  %v95_v3 = vld [vmem:[#allocation2 + $0x178] sm:$0xff] }
  0x11   :  { %v1079_v50 = vpack.c.bf16 %v1075_v48, %v1070_v47  ;;  %v1086_v51 = vld [vmem:[%s1307_s2] sm:$0x7]  ;;  %s1016_s2 = smov 96   ;;  %v86_v4 = vld [vmem:[#allocation2 + $0x130] sm:$0xff]  ;;  %v89_v7 = vld [vmem:[#allocation2 + $0x148] sm:$0xff] }
  0x12   :  { %131 = vmatpush.bf16.msra.mxu0 %v112_v19  ;;  %v124_v52 = vperm.slane %v1086_v51, 1  ;;  %v123_v53 = vperm.slane %v1086_v51, 0  ;;  %v92_v2 = vld [vmem:[#allocation2 + $0x160] sm:$0xff]  ;;  %v117_v10 = vpack.c.bf16 %v89_v7, %v86_v4  ;;  %v83_v14 = vld [vmem:[#allocation2 + $0x118] sm:$0xff]  ;;  %v74_v19 = vld [vmem:[#allocation2 + $0xd0] sm:$0xff] }
  0x13   :  { %v120_v6 = vpack.c.bf16 %v95_v3, %v92_v2  ;;  %v80_v13 = vld [vmem:[#allocation2 + $0x100] sm:$0xff]  ;;  %v77_v20 = vld [vmem:[#allocation2 + $0xe8] sm:$0xff]  ;;  %v62_v27 = vld [vmem:[#allocation2 + $0x70] sm:$0xff] }
  0x14   :  { %146 = vmatpush.bf16.msra.mxu1 %v110_v22  ;;  %v114_v18 = vpack.c.bf16 %v83_v14, %v80_v13  ;;  %v111_v22 = vpack.c.bf16 %v77_v20, %v74_v19  ;;  %v68_v24 = vld [vmem:[#allocation2 + $0xa0] sm:$0xff]  ;;  %v50_v33 = vld [vmem:[#allocation2 + $0x10] sm:$0xff] }
  0x15   :  { %157 = vmatpush.bf16.msra.mxu2 %v120_v6  ;;  %v56_v30 = vld [vmem:[#allocation2 + $0x40] sm:$0xff] }
  0x16   :  { %132 = vmatpush.bf16.msra.mxu0 %v109_v25  ;;  %v71_v25 = vld [vmem:[#allocation2 + $0xb8] sm:$0xff] }
  0x17   :  { %v108_v26 = vpack.c.bf16 %v71_v25, %v68_v24 }
  0x18   :  { %147 = vmatpush.bf16.msra.mxu1 %v107_v28  ;;  %v65_v28 = vld [vmem:[#allocation2 + $0x88] sm:$0xff] }
  0x19   :  { %158 = vmatpush.bf16.msra.mxu2 %v117_v10  ;;  %v105_v29 = vpack.c.bf16 %v65_v28, %v62_v27 }
  0x1a   :  { %133 = vmatpush.bf16.msra.mxu0 %v106_v31  ;;  %v59_v31 = vld [vmem:[#allocation2 + $0x58] sm:$0xff] }
  0x1b   :  { %v102_v32 = vpack.c.bf16 %v59_v31, %v56_v30 }
  0x1c   :  { %148 = vmatpush.bf16.msra.mxu1 %v104_v34  ;;  %v53_v34 = vld [vmem:[#allocation2 + $0x28] sm:$0xff] }
  0x1d   :  { %159 = vmatpush.bf16.msra.mxu2 %v114_v18  ;;  %v99_v35 = vpack.c.bf16 %v53_v34, %v50_v33 }
  0x1e   :  { %134 = vmatpush.bf16.msra.mxu0 %v103_v37 }
  0x20   :  { %149 = vmatpush.bf16.msra.mxu1 %v101_v40 }
  0x21   :  { %160 = vmatpush.bf16.msra.mxu2 %v111_v22 }
  0x22   :  { %135 = vmatpush.bf16.msra.mxu0 %v100_v43 }
  0x24   :  { %150 = vmatpush.bf16.msra.mxu1 %v98_v46 }
  0x25   :  { %161 = vmatpush.bf16.msra.mxu2 %v108_v26 }
  0x26   :  { %136 = vmatpush.bf16.msra.mxu0 %v97_v49 }
  0x27   :  { %151 = vmatmul.bf16.vlgmr.msra.gmra.mxu1 %v1079_v50 }
  0x29   :  { %137 = vmatmul.bf16.vlgmr.msra.gmra.mxu0 %v1079_v50  ;;  %162 = vmatpush.bf16.msra.mxu2 %v105_v29 }
  0x2d   :  { %163 = vmatpush.bf16.msra.mxu2 %v102_v32 }
  0x31   :  { %164 = vmatpush.bf16.msra.mxu2 %v99_v35 }
  0x34   :  { %165 = vmatmul.bf16.vlgmr.msra.gmra.mxu2 %v1079_v50 }
  0xa4   :  { %v152_v54 = vpop.f32.mrf.mxu1 }
  0xa5   :  { %v153_v55 = vadd.f32 %v152_v54, %v124_v52 }
  0xa6   :  { %v138_v56 = vpop.f32.mrf.mxu0 }
  0xa7   :  { %v139_v57 = vadd.f32 %v138_v56, %v123_v53  ;;  %v175_v58 = vpack.c.bf16 %v153_v55, %v153_v55 }
  0xa9   :  { %v324_v59 = vunpack.c.l.b16 %v175_v58  ;;  %v182_v60 = vsel %vm177_vm0, %v175_v58, 0  ;;  %v173_v61 = vpack.c.bf16 %v139_v57, %v139_v57 }
  0xaa   :  { %191 = vmatpush.bf16.xpose.msra.mxu3 %v182_v60 }
  0xab   :  { %v325_v62 = vpack.c.b16 %v324_v59, %v324_v59  ;;  %v319_v5 = vunpack.c.l.b16 %v173_v61 }
  0xac   :  { %v154_v63 = vpop.f32.mrf.mxu1 }
  0xad   :  { %v155_v0 = vadd.f32 %v154_v63, %v124_v52  ;;  %480 = vrot.lane.b32.xlu2 %v325_v62, %s1015_s0  ;;  %326 = vrot.lane.b32.xlu0 %v325_v62, %s1016_s2  ;;  %v320_v15 = vpack.c.b16 %v319_v5, %v319_v5  ;;  %v1117_v52 = vld [vmem:[%s1312_s7] ss:$0 sm:$0xff]  ;;  %v125_v5 = vperm.slane %v1086_v51, 2 }
  0xae   :  { %v140_v1 = vpop.f32.mrf.mxu0 }
  0xaf   :  { %v176_v8 = vpack.c.bf16 %v155_v0, %v155_v0  ;;  %v141_v9 = vadd.f32 %v140_v1, %v123_v53 }
  0xb1   :  { %v353_v11 = vunpack.c.l.b16 %v176_v8  ;;  %905 = vmatmul.msk.bf16.vlgmr.msra.gmra.mxu3 %vm177_vm0, %v173_v61  ;;  %v201_v12 = vsel %vm177_vm0, %v176_v8, 0  ;;  %v174_v17 = vpack.c.bf16 %v141_v9, %v141_v9 }
  0xb2   :  { %210 = vmatpush.bf16.xpose.msrb.mxu3 %v201_v12 }
  0xb3   :  { %v354_v16 = vpack.c.b16 %v353_v11, %v353_v11  ;;  %v348_v21 = vunpack.c.l.b16 %v174_v17 }
  0xb5   :  { %355 = vrot.lane.b32.xlu1 %v354_v16, %s1016_s2  ;;  %503 = vrot.lane.b32.xlu2 %v354_v16, %s1015_s0  ;;  %v349_v23 = vpack.c.b16 %v348_v21, %v348_v21 }
  0xb6   :  { %321 = vrot.lane.b32.xlu0 %v320_v15, %s1016_s2 }
  0xb7   :  { %v166_v6 = vpop.f32.mrf.mxu2 }
  0xb8   :  { %v167_v7 = vadd.f32 %v166_v6, %v125_v5 }
  0xba   :  { %v277_v8 = vpack.c.bf16 %v167_v7, %v167_v7 }
  0xbc   :  { %v284_v9 = vsel %vm282_vm2, %v277_v8, 0 }
  0xbd   :  { %622 = vrot.lane.b32.xlu2 %v325_v62, %s1017_s17  ;;  %350 = vrot.lane.b32.xlu1 %v349_v23, %s1016_s2  ;;  %v1127_v62 = vld [vmem:[%s1312_s7 + $0x1] ss:$0 sm:$0xff] }
  0xbe   :  { %478 = vrot.lane.b32.xlu0 %v320_v15, %s1015_s0  ;;  %293 = vmatpush.bf16.msra.mxu3 %v284_v9 }
  0xbf   :  { %v168_v10 = vpop.f32.mrf.mxu2 }
  0xc0   :  { %v169_v11 = vadd.f32 %v168_v10, %v125_v5 }
  0xc1   :  { %906 = vmatmul.msk.bf16.vlgmr.msrb.gmra.mxu3 %vm177_vm0, %v174_v17 }
  0xc2   :  { %v1135_v12 = vpack.c.bf16 %v169_v11, %v169_v11 }
  0xc4   :  { %v303_v13 = vsel %vm282_vm2, %v1135_v12, 0 }
  0xc5   :  { %643 = vrot.lane.b32.xlu2 %v349_v23, %s1017_s17  ;;  %501 = vrot.lane.b32.xlu1 %v349_v23, %s1015_s0 }
  0xc6   :  { %645 = vrot.lane.b32.xlu0 %v354_v16, %s1017_s17  ;;  %312 = vmatpush.bf16.msrb.mxu0 %v303_v13 }
  0xcd   :  { %620 = vrot.lane.b32.xlu1 %v320_v15, %s1017_s17 }
 0x107   :  { %v481_v36 = vpop.permute.xlu2 %480 }
 0x108   :  { %v486_v37 = vsel %vm177_vm0, %v481_v36, 0 }
 0x109   :  { %495 = vmatpush.bf16.xpose.msrb.mxu1 %v486_v37 }
 0x10f   :  { %v504_v38 = vpop.permute.xlu2 %503 }
 0x110   :  { %v509_v46 = vsel %vm177_vm0, %v504_v38, 0 }
 0x117   :  { %v623_v39 = vpop.permute.xlu2 %622 }
 0x118   :  { %v628_v40 = vsel %vm177_vm0, %v623_v39, 0 }
 0x119   :  { %637 = vmatpush.bf16.xpose.msra.mxu1 %v628_v40 }
 0x11f   :  { %v327_v41 = vpop.permute.xlu0 %326  ;;  %v644_v4 = vpop.permute.xlu2 %643 }
 0x120   :  { %v332_v42 = vsel %vm177_vm0, %v327_v41, 0 }
 0x121   :  { %341 = vmatpush.bf16.xpose.msrb.mxu2 %v332_v42 }
 0x127   :  { %v356_v43 = vpop.permute.xlu1 %355 }
 0x128   :  { %v361_v44 = vsel %vm177_vm0, %v356_v43, 0  ;;  %v322_v45 = vpop.permute.xlu0 %321 }
 0x129   :  { %909 = vmatmul.msk.bf16.vlgmr.msrb.gmra.mxu2 %vm177_vm0, %v322_v45 }
 0x12a   :  { %370 = vmatpush.bf16.xpose.msra.mxu2 %v361_v44 }
 0x12f   :  { %v351_v49 = vpop.permute.xlu1 %350 }
 0x130   :  { %v479_v50 = vpop.permute.xlu0 %478 }
 0x131   :  { %913 = vmatmul.msk.bf16.vlgmr.msrb.gmra.mxu1 %vm177_vm0, %v479_v50 }
 0x132   :  { %518 = vmatpush.bf16.xpose.msrb.mxu2 %v509_v46 }
 0x134   :  { %v193_v53 = vpop.f32.mrf.mxu3 }
 0x135   :  { %v216_v54 = vmul.f32 0.17677669, %v193_v53 }
 0x137   :  { %v502_v55 = vpop.permute.xlu1 %501  ;;  %v224_v56 = vadd.f32 %v1117_v52, %v216_v54 }
 0x138   :  { %v646_v57 = vpop.permute.xlu0 %645 }
 0x139   :  { %v651_v58 = vsel %vm177_vm0, %v646_v57, 0  ;;  %910 = vmatmul.msk.bf16.vlgmr.msra.gmra.mxu2 %vm177_vm0, %v351_v49  ;;  %v227_v59 = vsel %vm226_vm1, %v224_v56, -inf }
 0x13a   :  { %660 = vmatpush.bf16.xpose.msra.mxu2 %v651_v58  ;;  %228 = vmax.xlane.f32.xlu0 %v227_v59 }
 0x13c   :  { %v195_v60 = vpop.f32.mrf.mxu3 }
 0x13f   :  { %v621_v61 = vpop.permute.xlu1 %620 }
 0x141   :  { %917 = vmatmul.msk.bf16.vlgmr.msra.gmra.mxu1 %vm177_vm0, %v621_v61 }
 0x144   :  { %v212_v63 = vpop.f32.mrf.mxu3 }
 0x145   :  { %v217_v0 = vmul.f32 0.17677669, %v212_v63 }
 0x147   :  { %v225_v1 = vadd.f32 %v1127_v62, %v217_v0 }
 0x149   :  { %914 = vmatmul.msk.bf16.vlgmr.msrb.gmra.mxu2 %vm177_vm0, %v502_v55  ;;  %v230_v2 = vsel %vm226_vm1, %v225_v1, -inf }
 0x14a   :  { %231 = vmax.xlane.f32.xlu1 %v230_v2 }
 0x14c   :  { %v214_v3 = vpop.f32.mrf.mxu3 }
 0x159   :  { %918 = vmatmul.msk.bf16.vlgmr.msra.gmra.mxu2 %vm177_vm0, %v644_v4 }
 0x1ac   :  { %v343_v14 = vpop.f32.mrf.mxu2 }
 0x1ad   :  { %v376_v15 = vmul.f32 0.17677669, %v343_v14  ;;  %v229_v16 = vpop.xlane.xlu0 %228 }
 0x1ae   :  { %v497_v17 = vpop.f32.mrf.mxu1  ;;  %v233_v51 = vsub.f32 %v224_v56, %v229_v16  ;;  %v431_v56 = vunpack.c.l.b16 %v277_v8 }
 0x1af   :  { %v524_v18 = vmul.f32 0.17677669, %v497_v17  ;;  %v378_v19 = vadd.f32 %v1117_v52, %v376_v15 }
 0x1b0   :  { %v235_v20 = vmul.f32 1.442695, %v233_v51  ;;  %v1168_v57 = vpack.c.b16 %v431_v56, %v431_v56 }
 0x1b1   :  { %v380_v21 = vsel %vm226_vm1, %v378_v19, -inf  ;;  %v526_v22 = vadd.f32 %v1117_v52, %v524_v18 }
 0x1b2   :  { %948 = vpow2.f32 %v235_v20  ;;  %381 = vmax.xlane.f32.xlu2 %v380_v21 }
 0x1b3   :  { %v528_v23 = vsel %vm226_vm1, %v526_v22, -inf }
 0x1b4   :  { %v345_v24 = vpop.f32.mrf.mxu2  ;;  %529 = vmax.xlane.f32.xlu0 %v528_v23 }
 0x1b6   :  { %v499_v25 = vpop.f32.mrf.mxu1 }
 0x1b7   :  { %v455_v25 = vunpack.c.l.b16 %v1135_v12 }
 0x1b8   :  { %v1143_v26 = vpop.eup %948 }
 0x1b9   :  { %v239_v27 = vsel %vm226_vm1, %v1143_v26, 0.0 }
 0x1bc   :  { %v372_v28 = vpop.f32.mrf.mxu2  ;;  %240 = vadd.xlane.f32.xlu0 %v239_v27 }
 0x1bd   :  { %v377_v29 = vmul.f32 0.17677669, %v372_v28  ;;  %v232_v30 = vpop.xlane.xlu1 %231 }
 0x1be   :  { %v639_v31 = vpop.f32.mrf.mxu1  ;;  %v234_v33 = vsub.f32 %v225_v1, %v232_v30 }
 0x1bf   :  { %v1148_v32 = vadd.f32 %v1127_v62, %v377_v29  ;;  %v666_v34 = vmul.f32 0.17677669, %v639_v31  ;;  %v456_v29 = vpack.c.b16 %v455_v25, %v455_v25 }
 0x1c0   :  { %v237_v36 = vmul.f32 1.442695, %v234_v33 }
 0x1c1   :  { %v383_v35 = vsel %vm226_vm1, %v1148_v32, -inf  ;;  %v668_v38 = vadd.f32 %v1117_v52, %v666_v34 }
 0x1c2   :  { %384 = vmax.xlane.f32.xlu2 %v383_v35  ;;  %950 = vpow2.f32 %v237_v36 }
 0x1c3   :  { %v670_v40 = vsel %vm226_vm1, %v668_v38, -inf }
 0x1c4   :  { %v374_v37 = vpop.f32.mrf.mxu2 }
 0x1c6   :  { %v641_v39 = vpop.f32.mrf.mxu1 }
 0x1c8   :  { %v1154_v43 = vpop.eup %950 }
 0x1c9   :  { %v242_v46 = vsel %vm226_vm1, %v1154_v43, 0.0 }
 0x1ca   :  { %671 = vmax.xlane.f32.xlu2 %v670_v40 }
 0x1cc   :  { %v520_v41 = vpop.f32.mrf.mxu2 }
 0x1cd   :  { %v525_v42 = vmul.f32 0.17677669, %v520_v41 }
 0x1cf   :  { %v1157_v44 = vadd.f32 %v1127_v62, %v525_v42 }
 0x1d1   :  { %v531_v45 = vsel %vm226_vm1, %v1157_v44, -inf }
 0x1d2   :  { %532 = vmax.xlane.f32.xlu1 %v531_v45  ;;  %243 = vadd.xlane.f32.xlu2 %v242_v46 }
 0x1d4   :  { %v522_v49 = vpop.f32.mrf.mxu2 }
 0x1dc   :  { %v662_v50 = vpop.f32.mrf.mxu2 }
 0x1dd   :  { %v667_v52 = vmul.f32 0.17677669, %v662_v50 }
 0x1df   :  { %v1164_v53 = vadd.f32 %v1127_v62, %v667_v52 }
 0x1e1   :  { %v673_v54 = vsel %vm226_vm1, %v1164_v53, -inf }
 0x1e2   :  { %674 = vmax.xlane.f32.xlu1 %v673_v54 }
 0x1e4   :  { %v664_v55 = vpop.f32.mrf.mxu2 }
 0x1fb   :  { %578 = vrot.lane.b32.xlu1 %v1168_v57, %s1015_s0 }
 0x225   :  { %v382_v58 = vpop.xlane.xlu2 %381 }
 0x226   :  { %v386_v59 = vsub.f32 %v378_v19, %v382_v58 }
 0x227   :  { %v530_v60 = vpop.xlane.xlu0 %529 }
 0x228   :  { %v388_v61 = vmul.f32 1.442695, %v386_v59  ;;  %v534_v63 = vsub.f32 %v526_v22, %v530_v60 }
 0x22a   :  { %952 = vpow2.f32 %v388_v61  ;;  %v536_v0 = vmul.f32 1.442695, %v534_v63 }
 0x22c   :  { %954 = vpow2.f32 %v536_v0 }
 0x22f   :  { %v241_v62 = vpop.xlane.xlu0 %240 }
 0x230   :  { %v1172_v1 = vpop.eup %952  ;;  %956 = vrcp.f32 %v241_v62  ;;  %v256_v9 = vand.u32 2147483648, %v241_v62  ;;  %v254_v11 = vand.u32 2147483647, %v241_v62  ;;  %vm250_vm4 = vweird.f32 %v241_v62 }
 0x231   :  { %v392_v2 = vsel %vm226_vm1, %v1172_v1, 0.0 }
 0x232   :  { %v1176_v3 = vpop.eup %954  ;;  %393 = vadd.xlane.f32.xlu0 %v392_v2  ;;  %v257_v15 = vor.u32 1.1754944e-38, %v256_v9  ;;  %vm255_vm6 = vcmp.eq.f32.partialorder %v254_v11, 8.507059e+37 }
 0x233   :  { %v540_v4 = vsel %vm226_vm1, %v1176_v3, 0.0 }
 0x234   :  { %541 = vadd.xlane.f32.xlu2 %v540_v4 }
 0x235   :  { %v385_v5 = vpop.xlane.xlu2 %384 }
 0x236   :  { %v957_v6 = vpop.eup %956  ;;  %v387_v18 = vsub.f32 %v1148_v32, %v385_v5 }
 0x237   :  { %v246_v7 = vmul.f32 %v957_v6, %v241_v62  ;;  %vm251_vm3 = vweird.f32 %v957_v6 }
 0x238   :  { %vm252_vm5 = vmor %vm250_vm4, %vm251_vm3  ;;  %v390_v22 = vmul.f32 1.442695, %v387_v18 }
 0x239   :  { %v247_v8 = vsub.f32 1.0, %v246_v7 }
 0x23b   :  { %v248_v10 = vmul.f32 %v957_v6, %v247_v8 }
 0x23d   :  { %v249_v13 = vadd.f32 %v957_v6, %v248_v10  ;;  %v672_v14 = vpop.xlane.xlu2 %671 }
 0x23e   :  { %v676_v16 = vsub.f32 %v668_v38, %v672_v14 }
 0x23f   :  { %v253_v17 = vsel %vm252_vm5, %v957_v6, %v249_v13 }
 0x240   :  { %v258_v51 = vsel %vm255_vm6, %v257_v15, %v253_v17  ;;  %v678_v19 = vmul.f32 1.442695, %v676_v16 }
 0x241   :  { %v259_v20 = vmul.f32 %v1143_v26, %v258_v51 }
 0x242   :  { %958 = vpow2.f32 %v678_v19 }
 0x243   :  { %v275_v21 = vpack.c.bf16 %v259_v20, %v259_v20 }
 0x245   :  { %907 = vmatmul.msk.bf16.vlgmr.msra.gmra.mxu3 %vm226_vm1, %v275_v21  ;;  %v244_v23 = vpop.xlane.xlu2 %243  ;;  %v533_v24 = vpop.xlane.xlu1 %532 }
 0x246   :  { %960 = vrcp.f32 %v244_v23  ;;  %433 = vrot.lane.b32.xlu0 %v1168_v57, %s1016_s2  ;;  %v535_v28 = vsub.f32 %v1157_v44, %v533_v24  ;;  %v271_v34 = vand.u32 2147483648, %v244_v23  ;;  %v269_v36 = vand.u32 2147483647, %v244_v23 }
 0x247   :  { %962 = vpow2.f32 %v390_v22  ;;  %vm265_vm8 = vweird.f32 %v244_v23 }
 0x248   :  { %v1186_v27 = vpop.eup %958  ;;  %v538_v31 = vmul.f32 1.442695, %v535_v28  ;;  %v272_v39 = vor.u32 1.1754944e-38, %v271_v34  ;;  %vm270_vm10 = vcmp.eq.f32.partialorder %v269_v36, 8.507059e+37 }
 0x249   :  { %v682_v26 = vsel %vm226_vm1, %v1186_v27, 0.0 }
 0x24a   :  { %683 = vadd.xlane.f32.xlu1 %v682_v26  ;;  %964 = vpow2.f32 %v538_v31 }
 0x24c   :  { %v961_v30 = vpop.eup %960  ;;  %457 = vrot.lane.b32.xlu2 %v456_v29, %s1016_s2 }
 0x24d   :  { %v261_v32 = vmul.f32 %v961_v30, %v244_v23  ;;  %v1192_v12 = vpop.eup %962  ;;  %vm266_vm7 = vweird.f32 %v961_v30 }
 0x24e   :  { %v395_v37 = vsel %vm226_vm1, %v1192_v12, 0.0  ;;  %vm267_vm9 = vmor %vm265_vm8, %vm266_vm7 }
 0x24f   :  { %v262_v33 = vsub.f32 1.0, %v261_v32 }
 0x250   :  { %v1197_v41 = vpop.eup %964 }
 0x251   :  { %v263_v35 = vmul.f32 %v961_v30, %v262_v33  ;;  %v543_v45 = vsel %vm226_vm1, %v1197_v41, 0.0 }
 0x252   :  { %396 = vadd.xlane.f32.xlu1 %v395_v37 }
 0x253   :  { %v264_v38 = vadd.f32 %v961_v30, %v263_v35 }
 0x254   :  { %599 = vrot.lane.b32.xlu2 %v456_v29, %s1015_s0 }
 0x255   :  { %v268_v40 = vsel %vm267_vm9, %v961_v30, %v264_v38  ;;  %v675_v49 = vpop.xlane.xlu1 %674 }
 0x256   :  { %v273_v42 = vsel %vm270_vm10, %v272_v39, %v268_v40  ;;  %v677_v50 = vsub.f32 %v1164_v53, %v675_v49 }
 0x257   :  { %v274_v44 = vmul.f32 %v1154_v43, %v273_v42 }
 0x258   :  { %v680_v52 = vmul.f32 1.442695, %v677_v50 }
 0x259   :  { %v276_v46 = vpack.c.bf16 %v274_v44, %v274_v44 }
 0x25a   :  { %544 = vadd.xlane.f32.xlu1 %v543_v45  ;;  %966 = vpow2.f32 %v680_v52 }
 0x25b   :  { %908 = vmatmul.msk.bf16.vlgmr.msrb.gmra.mxu0 %vm226_vm1, %v276_v46 }
 0x25c   :  { %720 = vrot.lane.b32.xlu2 %v1168_v57, %s1017_s17 }
 0x260   :  { %v1206_v54 = vpop.eup %966 }
 0x261   :  { %v685_v43 = vsel %vm226_vm1, %v1206_v54, 0.0 }
 0x26d   :  { %v579_v6 = vpop.permute.xlu1 %578 }
 0x26e   :  { %v584_v17 = vsel %vm282_vm2, %v579_v6, 0 }
 0x270   :  { %686 = vadd.xlane.f32.xlu0 %v685_v43 }
 0x273   :  { %741 = vrot.lane.b32.xlu1 %v456_v29, %s1017_s17 }
 0x2a5   :  { %v394_v55 = vpop.xlane.xlu0 %393 }
 0x2a6   :  { %968 = vrcp.f32 %v394_v55  ;;  %v409_v53 = vand.u32 2147483648, %v394_v55  ;;  %v407_v62 = vand.u32 2147483647, %v394_v55  ;;  %vm403_vm12 = vweird.f32 %v394_v55 }
 0x2a7   :  { %v542_v56 = vpop.xlane.xlu2 %541 }
 0x2a8   :  { %970 = vrcp.f32 %v542_v56  ;;  %v410_v5 = vor.u32 1.1754944e-38, %v409_v53  ;;  %vm408_vm14 = vcmp.eq.f32.partialorder %v407_v62, 8.507059e+37  ;;  %v557_v20 = vand.u32 2147483648, %v542_v56 }
 0x2a9   :  { %vm551_vm3 = vweird.f32 %v542_v56 }
 0x2aa   :  { %v558_v24 = vor.u32 1.1754944e-38, %v557_v20 }
 0x2ac   :  { %v969_v58 = vpop.eup %968 }
 0x2ad   :  { %v399_v59 = vmul.f32 %v969_v58, %v394_v55  ;;  %vm404_vm11 = vweird.f32 %v969_v58 }
 0x2ae   :  { %v971_v60 = vpop.eup %970  ;;  %vm405_vm13 = vmor %vm403_vm12, %vm404_vm11 }
 0x2af   :  { %v400_v57 = vsub.f32 1.0, %v399_v59  ;;  %v458_v61 = vpop.permute.xlu2 %457  ;;  %v547_v2 = vmul.f32 %v971_v60, %v542_v56  ;;  %vm552_vm15 = vweird.f32 %v971_v60 }
 0x2b0   :  { %v463_v63 = vsel %vm282_vm2, %v458_v61, 0  ;;  %vm553_vm4 = vmor %vm551_vm3, %vm552_vm15 }
 0x2b1   :  { %v401_v0 = vmul.f32 %v969_v58, %v400_v57  ;;  %472 = vmatpush.bf16.msra.mxu0 %v463_v63  ;;  %v548_v8 = vsub.f32 1.0, %v547_v2 }
 0x2b3   :  { %v402_v4 = vadd.f32 %v969_v58, %v401_v0  ;;  %v549_v15 = vmul.f32 %v971_v60, %v548_v8 }
 0x2b5   :  { %v406_v7 = vsel %vm405_vm13, %v969_v58, %v402_v4  ;;  %v550_v18 = vadd.f32 %v971_v60, %v549_v15 }
 0x2b6   :  { %v411_v9 = vsel %vm408_vm14, %v410_v5, %v406_v7 }
 0x2b7   :  { %v412_v10 = vmul.f32 %v1172_v1, %v411_v9  ;;  %v600_v11 = vpop.permute.xlu2 %599  ;;  %v555_v1 = vand.u32 2147483647, %v542_v56  ;;  %v554_v23 = vsel %vm553_vm4, %v971_v60, %v550_v18 }
 0x2b8   :  { %v605_v13 = vsel %vm282_vm2, %v600_v11, 0  ;;  %v434_v14 = vpop.permute.xlu0 %433 }
 0x2b9   :  { %v439_v16 = vsel %vm282_vm2, %v434_v14, 0  ;;  %614 = vmatpush.bf16.msrb.mxu0 %v605_v13  ;;  %v428_v51 = vpack.c.bf16 %v412_v10, %v412_v10  ;;  %vm556_vm5 = vcmp.eq.f32.partialorder %v555_v1, 8.507059e+37 }
 0x2ba   :  { %448 = vmatpush.bf16.msrb.mxu3 %v439_v16  ;;  %v559_v28 = vsel %vm556_vm5, %v558_v24, %v554_v23 }
 0x2bb   :  { %v560_v30 = vmul.f32 %v1176_v3, %v559_v28 }
 0x2bd   :  { %911 = vmatmul.msk.bf16.vlgmr.msrb.gmra.mxu3 %vm226_vm1, %v428_v51  ;;  %v684_v19 = vpop.xlane.xlu1 %683  ;;  %v576_v34 = vpack.c.bf16 %v560_v30, %v560_v30 }
 0x2be   :  { %593 = vmatpush.bf16.msra.mxu3 %v584_v17  ;;  %972 = vrcp.f32 %v684_v19  ;;  %v699_v39 = vand.u32 2147483648, %v684_v19  ;;  %vm693_vm7 = vweird.f32 %v684_v19  ;;  %v697_v40 = vand.u32 2147483647, %v684_v19 }
 0x2bf   :  { %v721_v21 = vpop.permute.xlu2 %720 }
 0x2c0   :  { %v726_v22 = vsel %vm282_vm2, %v721_v21, 0  ;;  %v700_v50 = vor.u32 1.1754944e-38, %v699_v39  ;;  %vm698_vm10 = vcmp.eq.f32.partialorder %v697_v40, 8.507059e+37  ;;  %v808_v40 = vld [vmem:[%s1308_s3 + $0x70] sm:$0xff] }
 0x2c2   :  { %735 = vmatpush.bf16.msrb.mxu3 %v726_v22 }
 0x2c4   :  { %v973_v25 = vpop.eup %972 }
 0x2c5   :  { %v689_v26 = vmul.f32 %v973_v25, %v684_v19  ;;  %v397_v29 = vpop.xlane.xlu1 %396  ;;  %vm694_vm6 = vweird.f32 %v973_v25 }
 0x2c6   :  { %974 = vrcp.f32 %v397_v29  ;;  %vm695_vm8 = vmor %vm693_vm7, %vm694_vm6  ;;  %v424_v44 = vand.u32 2147483648, %v397_v29  ;;  %v422_v49 = vand.u32 2147483647, %v397_v29  ;;  %vm418_vm11 = vweird.f32 %v397_v29 }
 0x2c7   :  { %v690_v31 = vsub.f32 1.0, %v689_v26 }
 0x2c8   :  { %v1219_v32 = vpop.f32.mrf.mxu3  ;;  %v425_v56 = vor.u32 1.1754944e-38, %v424_v44  ;;  %vm423_vm13 = vcmp.eq.f32.partialorder %v422_v49, 8.507059e+37  ;;  %v806_v44 = vld [vmem:[%s1308_s3 + $0x60] sm:$0xff]  ;;  %v804_v49 = vld [vmem:[%s1308_s3 + $0x50] sm:$0xff] }
 0x2c9   :  { %v691_v33 = vmul.f32 %v973_v25, %v690_v31 }
 0x2cb   :  { %v692_v36 = vadd.f32 %v973_v25, %v691_v33 }
 0x2cc   :  { %v975_v35 = vpop.eup %974 }
 0x2cd   :  { %v414_v37 = vmul.f32 %v975_v35, %v397_v29  ;;  %915 = vmatmul.msk.bf16.vlgmr.msra.gmra.mxu3 %vm226_vm1, %v576_v34  ;;  %v545_v38 = vpop.xlane.xlu1 %544  ;;  %v696_v45 = vsel %vm695_vm8, %v973_v25, %v692_v36  ;;  %vm419_vm9 = vweird.f32 %v975_v35 }
 0x2ce   :  { %976 = vrcp.f32 %v545_v38  ;;  %v701_v55 = vsel %vm698_vm10, %v700_v50, %v696_v45  ;;  %vm420_vm12 = vmor %vm418_vm11, %vm419_vm9  ;;  %v572_v5 = vand.u32 2147483648, %v545_v38  ;;  %vm566_vm15 = vweird.f32 %v545_v38  ;;  %v807_v45 = vld [vmem:[%s1308_s3 + $0x68] sm:$0xff]  ;;  %v805_v50 = vld [vmem:[%s1308_s3 + $0x58] sm:$0xff] }
 0x2cf   :  { %v415_v42 = vsub.f32 1.0, %v414_v37  ;;  %v702_v57 = vmul.f32 %v1186_v27, %v701_v55  ;;  %v570_v6 = vand.u32 2147483647, %v545_v38  ;;  %v803_v55 = vld [vmem:[%s1308_s3 + $0x48] sm:$0xff] }
 0x2d0   :  { %v297_v3 = vpop.f32.mrf.mxu3  ;;  %v573_v27 = vor.u32 1.1754944e-38, %v572_v5  ;;  %v795_v5 = vld [vmem:[%s1308_s3 + $0x8] sm:$0xff] }
 0x2d1   :  { %v416_v46 = vmul.f32 %v975_v35, %v415_v42  ;;  %v718_v4 = vpack.c.bf16 %v702_v57, %v702_v57  ;;  %vm571_vm4 = vcmp.eq.f32.partialorder %v570_v6, 8.507059e+37  ;;  %v809_v42 = vld [vmem:[%s1308_s3 + $0x78] sm:$0xff]  ;;  %v798_v57 = vld [vmem:[%s1308_s3 + $0x20] sm:$0xff] }
 0x2d2   :  { %v818_v3 = vpack.c.bf16 %v809_v42, %v808_v40 }
 0x2d3   :  { %v417_v52 = vadd.f32 %v975_v35, %v416_v46  ;;  %v817_v46 = vpack.c.bf16 %v807_v45, %v806_v44 }
 0x2d4   :  { %v977_v43 = vpop.eup %976  ;;  %823 = vmatpush.bf16.msrb.mxu1 %v818_v3 }
 0x2d5   :  { %v421_v58 = vsel %vm420_vm12, %v975_v35, %v417_v52  ;;  %v562_v59 = vmul.f32 %v977_v43, %v545_v38  ;;  %vm567_vm14 = vweird.f32 %v977_v43  ;;  %v816_v52 = vpack.c.bf16 %v805_v50, %v804_v49 }
 0x2d6   :  { %v426_v60 = vsel %vm423_vm13, %v425_v56, %v421_v58  ;;  %vm568_vm3 = vmor %vm566_vm15, %vm567_vm14  ;;  %v800_v58 = vld [vmem:[%s1308_s3 + $0x30] sm:$0xff] }
 0x2d7   :  { %v427_v61 = vmul.f32 %v1192_v12, %v426_v60  ;;  %v563_v53 = vsub.f32 1.0, %v562_v59  ;;  %v801_v59 = vld [vmem:[%s1308_s3 + $0x38] sm:$0xff] }
 0x2d8   :  { %v1224_v63 = vpop.f32.mrf.mxu0  ;;  %824 = vmatpush.bf16.msrb.mxu1 %v817_v46  ;;  %v814_v60 = vpack.c.bf16 %v801_v59, %v800_v58  ;;  %v946_v58 = vld [vmem:[%s1310_s5] ss:$0 sm:$0xff] }
 0x2d9   :  { %v564_v0 = vmul.f32 %v977_v43, %v563_v53  ;;  %v429_v62 = vpack.c.bf16 %v427_v61, %v427_v61  ;;  %v799_v61 = vld [vmem:[%s1308_s3 + $0x28] sm:$0xff]  ;;  %v796_v53 = vld [vmem:[%s1308_s3 + $0x10] sm:$0xff] }
 0x2db   :  { %v565_v2 = vadd.f32 %v977_v43, %v564_v0  ;;  %912 = vmatmul.msk.bf16.vlgmr.msra.gmra.mxu0 %vm226_vm1, %v429_v62  ;;  %v813_v0 = vpack.c.bf16 %v799_v61, %v798_v57  ;;  %v797_v62 = vld [vmem:[%s1308_s3 + $0x18] sm:$0xff]  ;;  %v947_v57 = vld [vmem:[%s1311_s6] ss:$0 sm:$0xff] }
 0x2dc   :  { %825 = vmatpush.bf16.msrb.mxu1 %v816_v52 }
 0x2dd   :  { %919 = vmatmul.msk.bf16.vlgmr.msrb.gmra.mxu3 %vm226_vm1, %v718_v4  ;;  %v569_v7 = vsel %vm568_vm3, %v977_v43, %v565_v2  ;;  %v802_v43 = vld [vmem:[%s1308_s3 + $0x40] sm:$0xff]  ;;  %v812_v2 = vpack.c.bf16 %v797_v62, %v796_v53 }
 0x2de   :  { %v574_v12 = vsel %vm571_vm4, %v573_v27, %v569_v7  ;;  %v815_v56 = vpack.c.bf16 %v803_v55, %v802_v43  ;;  %v794_v4 = vld [vmem:[%s1308_s3] sm:$0xff] }
 0x2df   :  { %v575_v10 = vmul.f32 %v1197_v41, %v574_v12  ;;  %v811_v6 = vpack.c.bf16 %v795_v5, %v794_v4 }
 0x2e0   :  { %v316_v8 = vpop.f32.mrf.mxu0  ;;  %826 = vmatpush.bf16.msrb.mxu1 %v815_v56 }
 0x2e1   :  { %v577_v14 = vpack.c.bf16 %v575_v10, %v575_v10 }
 0x2e3   :  { %v687_v9 = vpop.xlane.xlu0 %686 }
 0x2e4   :  { %978 = vrcp.f32 %v687_v9  ;;  %v714_v51 = vand.u32 2147483648, %v687_v9  ;;  %v712_v19 = vand.u32 2147483647, %v687_v9  ;;  %vm708_vm6 = vweird.f32 %v687_v9  ;;  %827 = vmatpush.bf16.msrb.mxu1 %v814_v60 }
 0x2e5   :  { %v742_v11 = vpop.permute.xlu1 %741 }
 0x2e6   :  { %v747_v13 = vsel %vm282_vm2, %v742_v11, 0  ;;  %v715_v1 = vor.u32 1.1754944e-38, %v714_v51  ;;  %vm713_vm8 = vcmp.eq.f32.partialorder %v712_v19, 8.507059e+37  ;;  %vm791_vm2 = vcmask 785408  }
 0x2e7   :  { %756 = vmatpush.bf16.msra.mxu0 %v747_v13 }
 0x2e8   :  { %828 = vmatpush.bf16.msrb.mxu1 %v813_v0 }
 0x2ea   :  { %v979_v15 = vpop.eup %978 }
 0x2eb   :  { %v704_v16 = vmul.f32 %v979_v15, %v687_v9  ;;  %916 = vmatmul.msk.bf16.vlgmr.msrb.gmra.mxu0 %vm226_vm1, %v577_v14  ;;  %vm709_vm5 = vweird.f32 %v979_v15 }
 0x2ec   :  { %vm710_vm7 = vmor %vm708_vm6, %vm709_vm5  ;;  %829 = vmatpush.bf16.msrb.mxu1 %v812_v2 }
 0x2ed   :  { %v705_v17 = vsub.f32 1.0, %v704_v16 }
 0x2ef   :  { %v706_v18 = vmul.f32 %v979_v15, %v705_v17 }
 0x2f0   :  { %830 = vmatpush.bf16.msrb.mxu1 %v811_v6 }
 0x2f1   :  { %v707_v20 = vadd.f32 %v979_v15, %v706_v18 }
 0x2f3   :  { %v711_v21 = vsel %vm710_vm7, %v979_v15, %v707_v20 }
 0x2f4   :  { %v716_v41 = vsel %vm713_vm8, %v715_v1, %v711_v21  ;;  %v945_v1 = vld [vmem:[%s1309_s4] ss:$0 sm:$0xff] }
 0x2f5   :  { %v717_v22 = vmul.f32 %v1206_v54, %v716_v41 }
 0x2f7   :  { %v719_v23 = vpack.c.bf16 %v717_v22, %v717_v22 }
 0x2fb   :  { %920 = vmatmul.msk.bf16.vlgmr.msra.gmra.mxu0 %vm226_vm1, %v719_v23  ;;  %vm788_vm1 = vcmask 523264  }
 0x340   :  { %v450_v24 = vpop.f32.mrf.mxu3 }
 0x348   :  { %v452_v25 = vpop.f32.mrf.mxu3 }
 0x350   :  { %v595_v28 = vpop.f32.mrf.mxu3 }
 0x358   :  { %v474_v26 = vpop.f32.mrf.mxu0  ;;  %v597_v29 = vpop.f32.mrf.mxu3 }
 0x359   :  { %v928_v30 = vpack.i.bf16 %v474_v26, %v450_v24  ;;  %v1018_v24 = vmov 128.0  }
 0x35a   :  { %980 = vrcp.f32 %v1018_v24 }
 0x35b   :  { %929 = vrot.lane.b32.xlu2 %v928_v30, %s1017_s17 }
 0x360   :  { %v476_v31 = vpop.f32.mrf.mxu0  ;;  %v737_v33 = vpop.f32.mrf.mxu3 }
 0x361   :  { %v981_v25 = vpop.eup %980 }
 0x368   :  { %v616_v34 = vpop.f32.mrf.mxu0  ;;  %v739_v35 = vpop.f32.mrf.mxu3 }
 0x369   :  { %v933_v36 = vpack.i.bf16 %v616_v34, %v595_v28  ;;  %v846_v28 = vmul.f32 128.0, %v981_v25 }
 0x36b   :  { %934 = vrot.lane.b32.xlu1 %v933_v36, %s1015_s0  ;;  %v847_v26 = vsub.f32 1.0, %v846_v28 }
 0x36d   :  { %v848_v29 = vmul.f32 %v981_v25, %v847_v26 }
 0x36f   :  { %v849_v30 = vadd.f32 %v981_v25, %v848_v29 }
 0x370   :  { %v618_v37 = vpop.f32.mrf.mxu0 }
 0x378   :  { %v758_v54 = vpop.f32.mrf.mxu0 }
 0x379   :  { %v938_v38 = vpack.i.bf16 %v758_v54, %v737_v33 }
 0x37b   :  { %939 = vrot.lane.b32.xlu2 %v938_v38, %s1016_s2 }
 0x380   :  { %v760_v39 = vpop.f32.mrf.mxu0 }
 0x3b5   :  { %v930_v7 = vpop.permute.xlu2 %929 }
 0x3b6   :  { %v932_v27 = vunpack.i.h.bf16 %v930_v7  ;;  %v931_v8 = vunpack.i.l.bf16 %v930_v7 }
 0x3b8   :  { %v787_v13 = vsel %vm177_vm0, %v1224_v63, %v932_v27  ;;  %v786_v14 = vsel %vm177_vm0, %v1219_v32, %v931_v8  ;;  %vm850_vm0 = vweird.f32 %v981_v25 }
 0x3b9   :  { %v851_v31 = vsel %vm850_vm0, %v981_v25, %v849_v30 }
 0x3d5   :  { %v940_v12 = vpop.permute.xlu2 %939 }
 0x3d6   :  { %v942_v15 = vunpack.i.h.bf16 %v940_v12  ;;  %v941_v16 = vunpack.i.l.bf16 %v940_v12 }
 0x3dd   :  { %v935_v9 = vpop.permute.xlu1 %934 }
 0x3de   :  { %v937_v10 = vunpack.i.h.bf16 %v935_v9  ;;  %v936_v11 = vunpack.i.l.bf16 %v935_v9 }
 0x3e0   :  { %v790_v17 = vsel %vm788_vm1, %v787_v13, %v937_v10  ;;  %v789_v51 = vsel %vm788_vm1, %v786_v14, %v936_v11 }
 0x3e1   :  { %v792_v18 = vsel %vm791_vm2, %v789_v51, %v941_v16  ;;  %v793_v19 = vsel %vm791_vm2, %v790_v17, %v942_v15 }
 0x3e2   :  { %v810_v20 = vpack.c.bf16 %v793_v19, %v792_v18 }
 0x3e4   :  { %831 = vmatmul.bf16.vlgmr.msrb.gmra.mxu1 %v810_v20 }
 0x461   :  { %v832_v21 = vpop.f32.mrf.mxu1 }
 0x462   :  { %v833_v41 = vadd.f32 %v945_v1, %v832_v21 }
 0x464   :  { %v837_v22 = vadd.f32 %v833_v41, %v1070_v47 }
 0x466   :  { %841 = vadd.xlane.f32.xlu1 %v837_v22 }
 0x469   :  { %v834_v63 = vpop.f32.mrf.mxu1 }
 0x46a   :  { %v835_v23 = vadd.f32 %v945_v1, %v834_v63 }
 0x46c   :  { %v838_v32 = vadd.f32 %v835_v23, %v1075_v48 }
 0x46e   :  { %843 = vadd.xlane.f32.xlu0 %v838_v32 }
 0x4d9   :  { %v842_v33 = vpop.xlane.xlu1 %841 }
 0x4da   :  { %v852_v34 = vmul.f32 %v851_v31, %v842_v33 }
 0x4dc   :  { %v854_v35 = vsub.f32 %v837_v22, %v852_v34 }
 0x4de   :  { %v856_v36 = vmul.f32 %v854_v35, %v854_v35 }
 0x4e0   :  { %858 = vadd.xlane.f32.xlu2 %v856_v36 }
 0x4e1   :  { %v844_v47 = vpop.xlane.xlu0 %843 }
 0x4e2   :  { %v853_v37 = vmul.f32 %v851_v31, %v844_v47 }
 0x4e4   :  { %v855_v54 = vsub.f32 %v838_v32, %v853_v37 }
 0x4e6   :  { %v857_v38 = vmul.f32 %v855_v54, %v855_v54 }
 0x4e8   :  { %860 = vadd.xlane.f32.xlu0 %v857_v38 }
 0x553   :  { %v859_v48 = vpop.xlane.xlu2 %858 }
 0x554   :  { %v862_v39 = vmul.f32 %v859_v48, %v851_v31 }
 0x556   :  { %v864_v40 = vadd.f32 1e-12, %v862_v39 }
 0x558   :  { %982 = vrsqrt.f32 %v864_v40  ;;  %vm872_vm10 = vweird.f32 %v864_v40 }
 0x55b   :  { %v861_v42 = vpop.xlane.xlu0 %860 }
 0x55c   :  { %v863_v44 = vmul.f32 %v861_v42, %v851_v31 }
 0x55e   :  { %v983_v3 = vpop.eup %982  ;;  %v865_v45 = vadd.f32 1e-12, %v863_v44 }
 0x55f   :  { %v867_v46 = vmul.f32 %v983_v3, %v864_v40  ;;  %vm873_vm9 = vweird.f32 %v983_v3 }
 0x560   :  { %984 = vrsqrt.f32 %v865_v45  ;;  %vm874_vm11 = vmor %vm872_vm10, %vm873_vm9  ;;  %vm882_vm13 = vweird.f32 %v865_v45 }
 0x561   :  { %v868_v49 = vmul.f32 %v983_v3, %v867_v46 }
 0x563   :  { %v869_v50 = vmul.f32 0.5, %v868_v49 }
 0x565   :  { %v870_v52 = vsub.f32 1.5, %v869_v50 }
 0x566   :  { %v985_v43 = vpop.eup %984 }
 0x567   :  { %v871_v55 = vmul.f32 %v983_v3, %v870_v52  ;;  %v877_v56 = vmul.f32 %v985_v43, %v865_v45  ;;  %vm883_vm12 = vweird.f32 %v985_v43 }
 0x568   :  { %vm884_vm14 = vmor %vm882_vm13, %vm883_vm12 }
 0x569   :  { %v875_v59 = vsel %vm874_vm11, %v983_v3, %v871_v55  ;;  %v878_v60 = vmul.f32 %v985_v43, %v877_v56 }
 0x56a   :  { %v886_v61 = vmul.f32 %v875_v59, %v854_v35 }
 0x56b   :  { %v879_v53 = vmul.f32 0.5, %v878_v60 }
 0x56c   :  { %v891_v0 = vmul.f32 %v946_v58, %v886_v61 }
 0x56d   :  { %v880_v62 = vsub.f32 1.5, %v879_v53 }
 0x56e   :  { %v896_v2 = vadd.f32 %v947_v57, %v891_v0 }
 0x56f   :  { %v881_v4 = vmul.f32 %v985_v43, %v880_v62 }
 0x570   :  { %898 = vst [vmem:[%s1313_s8] sm:$0xff] %v896_v2 }
 0x571   :  { %v885_v5 = vsel %vm884_vm14, %v985_v43, %v881_v4 }
 0x572   :  { %v887_v6 = vmul.f32 %v885_v5, %v855_v54 }
 0x574   :  { %v892_v7 = vmul.f32 %v946_v58, %v887_v6 }
 0x576   :  { %v897_v27 = vadd.f32 %v947_v57, %v892_v7 }
 0x578   :  { %899 = vst [vmem:[%s1313_s8 + $0x8] sm:$0xff] %v897_v27 }
 0x579   :  { %904 = vsyncpa [#allocation3], 1 }

</bundles_post_ra>
